<compile_context>
chip_gen: v7x
topology: tpu7x:2x2x1
jax: 0.10.0
libtpu: 0.0.40
codegen_flags: <defaults>
</compile_context>

<pallas_src>
import functools
import math

import jax
import jax.numpy as jnp
from jax import lax
from jax.experimental import pallas as pl
from jax.experimental.pallas import tpu as pltpu


def _round_up(x, m):
    return ((x + m - 1) // m) * m


def _conv_taps_kernel(w_ref, b_ref, xm_ref, xh_ref, o_ref, xwin_ref, *,
                      tm, tap_offsets, neg_slope):
    # w_ref:    (K*K, Cout, Cin)   bf16, EqualLR-scaled (resident across steps)
    # b_ref:    (Cout, 1)          f32
    # xm_ref:   (Cin, TM)          bf16  -- main tile of the flat padded grid
    # xh_ref:   (Cin, HALO_PAD)    bf16  -- head of the next tile (halo)
    # o_ref:    (Cout, TM)         out dtype (lane-dense full-width stores)
    # xwin_ref: (Cin, TM+HALO_PAD) bf16 scratch -- contiguous window so every
    #           tap is a static lane-shifted slice (in-kernel im2col).
    xwin_ref[:, :tm] = xm_ref[...]
    xwin_ref[:, tm:] = xh_ref[...]

    acc = None
    for t, off in enumerate(tap_offsets):           # static unroll over K*K taps
        part = jnp.dot(w_ref[t], xwin_ref[:, off:off + tm],
                       preferred_element_type=jnp.float32)   # MXU, f32 accumulate
        acc = part if acc is None else acc + part

    acc = acc + b_ref[...]                                   # bias (f32)
    acc = jnp.where(acc >= 0, acc, neg_slope * acc)          # LeakyReLU (f32)
    o_ref[...] = acc.astype(o_ref.dtype)


def equal_conv2d_lrelu_cm(x_cm, weight, bias, padding, *, negative_slope=0.2,
                          out_dtype=jnp.float32, compute_dtype=jnp.bfloat16,
                          vmem_budget_bytes=24 * 1024 * 1024, tm_cap=4096):
    """EqualConv2d (stride 1) + LeakyReLU(0.2) on a channel-major activation.

    x_cm: (Cin, B, H, W)  ->  (Cout, B, Hout, Wout), channel-major.
    """
    Cin, B, H, W = x_cm.shape
    Cout, Cin_w, K, K2 = weight.shape
    assert Cin == Cin_w and K == K2
    fan_in = Cin * K * K
    scale = math.sqrt(2.0 / fan_in)

    Hp, Wp = H + 2 * padding, W + 2 * padding
    Hout, Wout = Hp - K + 1, Wp - K + 1
    KK = K * K

    # --- weight / bias prep (tiny; EqualLR scale folded in once, not per step)
    w_taps = (weight.astype(jnp.float32) * scale).transpose(2, 3, 0, 1)
    w_taps = w_taps.reshape(KK, Cout, Cin).astype(compute_dtype)
    b_col = bias.astype(jnp.float32).reshape(Cout, 1)

    # --- flat-shift layout: compute on the full padded grid so tap (ky, kx)
    #     is the constant flat offset ky*Wp + kx (garbage rows/cols sliced off).
    tap_offsets = tuple(ky * Wp + kx for ky in range(K) for kx in range(K))
    halo = (K - 1) * (Wp + 1)
    halo_pad = max(128, _round_up(halo, 128))

    M = B * Hp * Wp                      # "wide" (padded-grid) output length

    # --- TM from a VMEM budget (fits the 32 MiB default scoped limit and
    #     v7x's smaller physical VMEM); multiple of halo_pad; >= 2 grid steps.
    itm_x = jnp.dtype(compute_dtype).itemsize
    itm_o = jnp.dtype(out_dtype).itemsize
    fixed = (2 * KK * Cout * Cin * itm_x          # resident weights (2 bufs, conservative)
             + 3 * Cin * halo_pad * itm_x         # halo stream (2 bufs) + window tail
             + 2 * Cout * 4)                      # bias
    per_col = 2 * Cin * itm_x + Cin * itm_x + 2 * Cout * itm_o
    tm_budget = max(halo_pad, (vmem_budget_bytes - fixed) // max(per_col, 1))
    tm_two = _round_up(pl.cdiv(M, 2), halo_pad)   # >= 2 tiles for v7x megacore
    tm = min(tm_budget, tm_cap, tm_two)
    tm = max(halo_pad, (tm // halo_pad) * halo_pad)
    assert tm % halo_pad == 0

    num_tiles = pl.cdiv(M, tm)
    m_pad = num_tiles * tm
    l_pad = m_pad + halo_pad

    xp = jnp.pad(x_cm.astype(compute_dtype),
                 ((0, 0), (0, 0), (padding, padding), (padding, padding)))
    x_flat = jnp.pad(xp.reshape(Cin, M), ((0, 0), (0, l_pad - M)))

    ratio = tm // halo_pad
    kernel = functools.partial(_conv_taps_kernel, tm=tm,
                               tap_offsets=tap_offsets,
                               neg_slope=negative_slope)

    out_mat = pl.pallas_call(
        kernel,
        out_shape=jax.ShapeDtypeStruct((Cout, m_pad), out_dtype),
        grid_spec=pltpu.PrefetchScalarGridSpec(
            num_scalar_prefetch=0,
            grid=(num_tiles,),
            in_specs=[
                pl.BlockSpec((KK, Cout, Cin), lambda i: (0, 0, 0)),   # weights (resident)
                pl.BlockSpec((Cout, 1), lambda i: (0, 0)),            # bias (resident)
                pl.BlockSpec((Cin, tm), lambda i: (0, i)),            # main x tile
                pl.BlockSpec((Cin, halo_pad),
                             lambda i: (0, (i + 1) * ratio)),         # halo (next tile head)
            ],
            out_specs=pl.BlockSpec((Cout, tm), lambda i: (0, i)),
            scratch_shapes=[pltpu.VMEM((Cin, tm + halo_pad), compute_dtype)],
        ),
        compiler_params=pltpu.CompilerParams(
            dimension_semantics=("parallel",),
            vmem_limit_bytes=48 * 1024 * 1024,
        ),
        cost_estimate=pl.CostEstimate(
            flops=2 * Cout * Cin * KK * m_pad,
            transcendentals=0,
            bytes_accessed=(Cin * l_pad * itm_x
                            + Cin * halo_pad * num_tiles * itm_x
                            + KK * Cout * Cin * itm_x
                            + Cout * m_pad * itm_o),
        ),
    )(w_taps, b_col, x_flat, x_flat)

    # Valid region of the wide (padded-grid) output.
    out = out_mat[:, :M].reshape(Cout, B, Hp, Wp)[:, :, :Hout, :Wout]
    return out


class ConvBlock:
    """JAX/Pallas counterpart of the StyleGAN1 ConvBlock (downsample=False)."""

    def __init__(self, in_channel, out_channel, kernel_size, padding,
                 kernel_size2=None, padding2=None, downsample=False,
                 fused=False, *, key):
        if downsample:
            # TODO(synk): Blur / FusedDownsample / AvgPool2d downsample branch not implemented in Pallas.
            raise NotImplementedError("downsample=True path is not implemented")
        self.pad1 = padding
        self.pad2 = padding if padding2 is None else padding2
        k1 = kernel_size
        k2 = kernel_size if kernel_size2 is None else kernel_size2
        k_a, k_b = jax.random.split(key)
        # EqualConv2d init: weight ~ N(0,1), bias = 0 (EqualLR scale at forward time).
        self.w1 = jax.random.normal(k_a, (out_channel, in_channel, k1, k1), jnp.float32)
        self.b1 = jnp.zeros((out_channel,), jnp.float32)
        self.w2 = jax.random.normal(k_b, (out_channel, out_channel, k2, k2), jnp.float32)
        self.b2 = jnp.zeros((out_channel,), jnp.float32)

    def __call__(self, x):
        # NCHW -> channel-major once at input; back to NCHW once at output.
        x_cm = jnp.transpose(x, (1, 0, 2, 3))
        h = equal_conv2d_lrelu_cm(x_cm, self.w1, self.b1, self.pad1,
                                  out_dtype=jnp.bfloat16)        # bf16 inter-layer activation
        out = equal_conv2d_lrelu_cm(h, self.w2, self.b2, self.pad2,
                                    out_dtype=jnp.float32)
        return jnp.transpose(out, (1, 0, 2, 3))


def _ref_conv_block(x, w1, b1, pad1, w2, b2, pad2, neg_slope=0.2):
    """Pure-JAX reference (lax.conv, f32) for correctness checking."""
    def eq_conv_lrelu(x, w, b, pad):
        fan_in = w.shape[1] * w.shape[2] * w.shape[3]
        ws = w * math.sqrt(2.0 / fan_in)
        out = lax.conv_general_dilated(
            x, ws, window_strides=(1, 1), padding=[(pad, pad), (pad, pad)],
            dimension_numbers=("NCHW", "OIHW", "NCHW"))
        out = out + b.reshape(1, -1, 1, 1)
        return jnp.where(out >= 0, out, neg_slope * out)
    return eq_conv_lrelu(eq_conv_lrelu(x, w1, b1, pad1), w2, b2, pad2)


if __name__ == "__main__":
    key = jax.random.PRNGKey(0)
    k_mod, k_x = jax.random.split(key)

    batch, in_channel, out_channel, size = 2, 4, 8, 16
    module = ConvBlock(in_channel, out_channel, kernel_size=3, padding=1, key=k_mod)

    x = jax.random.normal(k_x, (batch, in_channel, size, size), dtype=jnp.float32)

    out = jax.jit(module.__call__)(x)
    out = jax.block_until_ready(out)

    ref = _ref_conv_block(x, module.w1, module.b1, module.pad1,
                          module.w2, module.b2, module.pad2)
    ref = jax.block_until_ready(ref)

    assert out.shape == (batch, out_channel, size, size), out.shape
    assert out.dtype == jnp.float32, out.dtype
    max_err = float(jnp.max(jnp.abs(out - ref)))
    # bf16 MXU operands + bf16 inter-layer activation -> loosened tolerance.
    assert bool(jnp.allclose(out, ref, rtol=5e-2, atol=5e-2)), (
        "max abs err = %g" % max_err)

    print("KERNEL_OK")
</pallas_src>

<mosaic_0001>
module attributes {stable_mosaic.version = 11 : i64} {
  func.func @_conv_taps_kernel(%arg0: i32, %arg1: memref<9x8x4xbf16, #tpu.memory_space<vmem>>, %arg2: memref<8x1xf32, #tpu.memory_space<vmem>>, %arg3: memref<4x384xbf16, #tpu.memory_space<vmem>>, %arg4: memref<4x128xbf16, #tpu.memory_space<vmem>>, %arg5: memref<8x384xbf16, #tpu.memory_space<vmem>>, %arg6: memref<4x512xbf16, #tpu.memory_space<vmem>>) attributes {dimension_semantics = [#tpu.dimension_semantics<parallel>], iteration_bounds = array<i64: 2>, scalar_prefetch = 0 : i64, scratch_operands = 1 : i64, tpu.core_type = #tpu.core_type<tc>, window_params = [{pipeline_mode = #tpu.pipeline_mode<synchronous>, transform_indices = @transform_0, window_bounds = array<i64: 9, 8, 4>}, {pipeline_mode = #tpu.pipeline_mode<synchronous>, transform_indices = @transform_1, window_bounds = array<i64: 8, 1>}, {transform_indices = @transform_2, window_bounds = array<i64: 4, 384>}, {transform_indices = @transform_3, window_bounds = array<i64: 4, 128>}, {transform_indices = @transform_4, window_bounds = array<i64: 8, 384>}]} {
    %c0 = arith.constant 0 : index
    %c0_0 = arith.constant 0 : index
    %0 = vector.load %arg3[%c0, %c0_0] : memref<4x384xbf16, #tpu.memory_space<vmem>>, vector<4x384xbf16>
    %c0_1 = arith.constant 0 : index
    %c0_2 = arith.constant 0 : index
    %1 = vector.load %arg6[%c0_1, %c0_2] : memref<4x512xbf16, #tpu.memory_space<vmem>>, vector<4x384xbf16>
    tpu.vector_store %arg6[%c0_1, %c0_2], %0 {strides = array<i32>} : memref<4x512xbf16, #tpu.memory_space<vmem>>, vector<4x384xbf16>,
    %c0_3 = arith.constant 0 : index
    %c0_4 = arith.constant 0 : index
    %2 = vector.load %arg4[%c0_3, %c0_4] : memref<4x128xbf16, #tpu.memory_space<vmem>>, vector<4x128xbf16>
    %c0_5 = arith.constant 0 : index
    %c384 = arith.constant 384 : index
    %3 = vector.load %arg6[%c0_5, %c384] : memref<4x512xbf16, #tpu.memory_space<vmem>>, vector<4x128xbf16>
    tpu.vector_store %arg6[%c0_5, %c384], %2 {strides = array<i32>} : memref<4x512xbf16, #tpu.memory_space<vmem>>, vector<4x128xbf16>,
    %c0_6 = arith.constant 0 : index
    %c0_7 = arith.constant 0 : index
    %c0_8 = arith.constant 0 : index
    %4 = vector.load %arg1[%c0_6, %c0_7, %c0_8] : memref<9x8x4xbf16, #tpu.memory_space<vmem>>, vector<1x8x4xbf16>
    %5 = vector.shape_cast %4 : vector<1x8x4xbf16> to vector<8x4xbf16>
    %c0_9 = arith.constant 0 : index
    %c0_10 = arith.constant 0 : index
    %6 = vector.load %arg6[%c0_9, %c0_10] : memref<4x512xbf16, #tpu.memory_space<vmem>>, vector<4x384xbf16>
    %cst = arith.constant dense<0.000000e+00> : vector<8x384xf32>
    %7 = tpu.matmul %5, %6, %cst {dimension_numbers = #tpu.dot_dimension_numbers<[1], [0], [0], [1], [0, 0, 1, 1], [], []>} : vector<8x4xbf16>, vector<4x384xbf16>, vector<8x384xf32> -> vector<8x384xf32>
    %c1 = arith.constant 1 : index
    %c0_11 = arith.constant 0 : index
    %c0_12 = arith.constant 0 : index
    %8 = vector.load %arg1[%c1, %c0_11, %c0_12] : memref<9x8x4xbf16, #tpu.memory_space<vmem>>, vector<1x8x4xbf16>
    %9 = vector.shape_cast %8 : vector<1x8x4xbf16> to vector<8x4xbf16>
    %c0_13 = arith.constant 0 : index
    %c1_14 = arith.constant 1 : index
    %10 = vector.load %arg6[%c0_13, %c1_14] : memref<4x512xbf16, #tpu.memory_space<vmem>>, vector<4x384xbf16>
    %cst_15 = arith.constant dense<0.000000e+00> : vector<8x384xf32>
    %11 = tpu.matmul %9, %10, %cst_15 {dimension_numbers = #tpu.dot_dimension_numbers<[1], [0], [0], [1], [0, 0, 1, 1], [], []>} : vector<8x4xbf16>, vector<4x384xbf16>, vector<8x384xf32> -> vector<8x384xf32>
    %12 = arith.addf %7, %11 : vector<8x384xf32>
    %c2 = arith.constant 2 : index
    %c0_16 = arith.constant 0 : index
    %c0_17 = arith.constant 0 : index
    %13 = vector.load %arg1[%c2, %c0_16, %c0_17] : memref<9x8x4xbf16, #tpu.memory_space<vmem>>, vector<1x8x4xbf16>
    %14 = vector.shape_cast %13 : vector<1x8x4xbf16> to vector<8x4xbf16>
    %c0_18 = arith.constant 0 : index
    %c2_19 = arith.constant 2 : index
    %15 = vector.load %arg6[%c0_18, %c2_19] : memref<4x512xbf16, #tpu.memory_space<vmem>>, vector<4x384xbf16>
    %cst_20 = arith.constant dense<0.000000e+00> : vector<8x384xf32>
    %16 = tpu.matmul %14, %15, %cst_20 {dimension_numbers = #tpu.dot_dimension_numbers<[1], [0], [0], [1], [0, 0, 1, 1], [], []>} : vector<8x4xbf16>, vector<4x384xbf16>, vector<8x384xf32> -> vector<8x384xf32>
    %17 = arith.addf %12, %16 : vector<8x384xf32>
    %c3 = arith.constant 3 : index
    %c0_21 = arith.constant 0 : index
    %c0_22 = arith.constant 0 : index
    %18 = vector.load %arg1[%c3, %c0_21, %c0_22] : memref<9x8x4xbf16, #tpu.memory_space<vmem>>, vector<1x8x4xbf16>
    %19 = vector.shape_cast %18 : vector<1x8x4xbf16> to vector<8x4xbf16>
    %c0_23 = arith.constant 0 : index
    %c18 = arith.constant 18 : index
    %20 = vector.load %arg6[%c0_23, %c18] : memref<4x512xbf16, #tpu.memory_space<vmem>>, vector<4x384xbf16>
    %cst_24 = arith.constant dense<0.000000e+00> : vector<8x384xf32>
    %21 = tpu.matmul %19, %20, %cst_24 {dimension_numbers = #tpu.dot_dimension_numbers<[1], [0], [0], [1], [0, 0, 1, 1], [], []>} : vector<8x4xbf16>, vector<4x384xbf16>, vector<8x384xf32> -> vector<8x384xf32>
    %22 = arith.addf %17, %21 : vector<8x384xf32>
    %c4 = arith.constant 4 : index
    %c0_25 = arith.constant 0 : index
    %c0_26 = arith.constant 0 : index
    %23 = vector.load %arg1[%c4, %c0_25, %c0_26] : memref<9x8x4xbf16, #tpu.memory_space<vmem>>, vector<1x8x4xbf16>
    %24 = vector.shape_cast %23 : vector<1x8x4xbf16> to vector<8x4xbf16>
    %c0_27 = arith.constant 0 : index
    %c19 = arith.constant 19 : index
    %25 = vector.load %arg6[%c0_27, %c19] : memref<4x512xbf16, #tpu.memory_space<vmem>>, vector<4x384xbf16>
    %cst_28 = arith.constant dense<0.000000e+00> : vector<8x384xf32>
    %26 = tpu.matmul %24, %25, %cst_28 {dimension_numbers = #tpu.dot_dimension_numbers<[1], [0], [0], [1], [0, 0, 1, 1], [], []>} : vector<8x4xbf16>, vector<4x384xbf16>, vector<8x384xf32> -> vector<8x384xf32>
    %27 = arith.addf %22, %26 : vector<8x384xf32>
    %c5 = arith.constant 5 : index
    %c0_29 = arith.constant 0 : index
    %c0_30 = arith.constant 0 : index
    %28 = vector.load %arg1[%c5, %c0_29, %c0_30] : memref<9x8x4xbf16, #tpu.memory_space<vmem>>, vector<1x8x4xbf16>
    %29 = vector.shape_cast %28 : vector<1x8x4xbf16> to vector<8x4xbf16>
    %c0_31 = arith.constant 0 : index
    %c20 = arith.constant 20 : index
    %30 = vector.load %arg6[%c0_31, %c20] : memref<4x512xbf16, #tpu.memory_space<vmem>>, vector<4x384xbf16>
    %cst_32 = arith.constant dense<0.000000e+00> : vector<8x384xf32>
    %31 = tpu.matmul %29, %30, %cst_32 {dimension_numbers = #tpu.dot_dimension_numbers<[1], [0], [0], [1], [0, 0, 1, 1], [], []>} : vector<8x4xbf16>, vector<4x384xbf16>, vector<8x384xf32> -> vector<8x384xf32>
    %32 = arith.addf %27, %31 : vector<8x384xf32>
    %c6 = arith.constant 6 : index
    %c0_33 = arith.constant 0 : index
    %c0_34 = arith.constant 0 : index
    %33 = vector.load %arg1[%c6, %c0_33, %c0_34] : memref<9x8x4xbf16, #tpu.memory_space<vmem>>, vector<1x8x4xbf16>
    %34 = vector.shape_cast %33 : vector<1x8x4xbf16> to vector<8x4xbf16>
    %c0_35 = arith.constant 0 : index
    %c36 = arith.constant 36 : index
    %35 = vector.load %arg6[%c0_35, %c36] : memref<4x512xbf16, #tpu.memory_space<vmem>>, vector<4x384xbf16>
    %cst_36 = arith.constant dense<0.000000e+00> : vector<8x384xf32>
    %36 = tpu.matmul %34, %35, %cst_36 {dimension_numbers = #tpu.dot_dimension_numbers<[1], [0], [0], [1], [0, 0, 1, 1], [], []>} : vector<8x4xbf16>, vector<4x384xbf16>, vector<8x384xf32> -> vector<8x384xf32>
    %37 = arith.addf %32, %36 : vector<8x384xf32>
    %c7 = arith.constant 7 : index
    %c0_37 = arith.constant 0 : index
    %c0_38 = arith.constant 0 : index
    %38 = vector.load %arg1[%c7, %c0_37, %c0_38] : memref<9x8x4xbf16, #tpu.memory_space<vmem>>, vector<1x8x4xbf16>
    %39 = vector.shape_cast %38 : vector<1x8x4xbf16> to vector<8x4xbf16>
    %c0_39 = arith.constant 0 : index
    %c37 = arith.constant 37 : index
    %40 = vector.load %arg6[%c0_39, %c37] : memref<4x512xbf16, #tpu.memory_space<vmem>>, vector<4x384xbf16>
    %cst_40 = arith.constant dense<0.000000e+00> : vector<8x384xf32>
    %41 = tpu.matmul %39, %40, %cst_40 {dimension_numbers = #tpu.dot_dimension_numbers<[1], [0], [0], [1], [0, 0, 1, 1], [], []>} : vector<8x4xbf16>, vector<4x384xbf16>, vector<8x384xf32> -> vector<8x384xf32>
    %42 = arith.addf %37, %41 : vector<8x384xf32>
    %c8 = arith.constant 8 : index
    %c0_41 = arith.constant 0 : index
    %c0_42 = arith.constant 0 : index
    %43 = vector.load %arg1[%c8, %c0_41, %c0_42] : memref<9x8x4xbf16, #tpu.memory_space<vmem>>, vector<1x8x4xbf16>
    %44 = vector.shape_cast %43 : vector<1x8x4xbf16> to vector<8x4xbf16>
    %c0_43 = arith.constant 0 : index
    %c38 = arith.constant 38 : index
    %45 = vector.load %arg6[%c0_43, %c38] : memref<4x512xbf16, #tpu.memory_space<vmem>>, vector<4x384xbf16>
    %cst_44 = arith.constant dense<0.000000e+00> : vector<8x384xf32>
    %46 = tpu.matmul %44, %45, %cst_44 {dimension_numbers = #tpu.dot_dimension_numbers<[1], [0], [0], [1], [0, 0, 1, 1], [], []>} : vector<8x4xbf16>, vector<4x384xbf16>, vector<8x384xf32> -> vector<8x384xf32>
    %47 = arith.addf %42, %46 : vector<8x384xf32>
    %c0_45 = arith.constant 0 : index
    %c0_46 = arith.constant 0 : index
    %48 = vector.load %arg2[%c0_45, %c0_46] : memref<8x1xf32, #tpu.memory_space<vmem>>, vector<8x1xf32>
    %49 = vector.broadcast %48 : vector<8x1xf32> to vector<8x384xf32>
    %50 = arith.addf %47, %49 : vector<8x384xf32>
    %cst_47 = arith.constant 0.000000e+00 : f32
    %51 = vector.broadcast %cst_47 : f32 to vector<8x384xf32>
    %52 = arith.cmpf oge, %50, %51 : vector<8x384xf32>
    %cst_48 = arith.constant 2.000000e-01 : f32
    %53 = vector.broadcast %cst_48 : f32 to vector<8x384xf32>
    %54 = arith.mulf %53, %50 : vector<8x384xf32>
    %55 = arith.select %52, %50, %54 : vector<8x384xi1>, vector<8x384xf32>
    %56 = arith.truncf %55 : vector<8x384xf32> to vector<8x384xbf16>
    %c0_49 = arith.constant 0 : index
    %c0_50 = arith.constant 0 : index
    %57 = vector.load %arg5[%c0_49, %c0_50] : memref<8x384xbf16, #tpu.memory_space<vmem>>, vector<8x384xbf16>
    tpu.vector_store %arg5[%c0_49, %c0_50], %56 {strides = array<i32>} : memref<8x384xbf16, #tpu.memory_space<vmem>>, vector<8x384xbf16>,
    return
  }
  func.func @transform_0(%arg0: i32) -> (i32, i32, i32) {
    %c0_i32 = arith.constant 0 : i32
    %c0_i32_0 = arith.constant 0 : i32
    %c0_i32_1 = arith.constant 0 : i32
    %c0_i32_2 = arith.constant 0 : i32
    return %c0_i32, %c0_i32_0, %c0_i32_1 : i32, i32, i32
  }
  func.func @transform_1(%arg0: i32) -> (i32, i32) {
    %c0_i32 = arith.constant 0 : i32
    %c0_i32_0 = arith.constant 0 : i32
    %c0_i32_1 = arith.constant 0 : i32
    return %c0_i32, %c0_i32_0 : i32, i32
  }
  func.func @transform_2(%arg0: i32) -> (i32, i32) {
    %c0_i32 = arith.constant 0 : i32
    %c0_i32_0 = arith.constant 0 : i32
    return %c0_i32, %arg0 : i32, i32
  }
  func.func @transform_3(%arg0: i32) -> (i32, i32) {
    %c1_i32 = arith.constant 1 : i32
    %0 = arith.addi %arg0, %c1_i32 : i32
    %c3_i32 = arith.constant 3 : i32
    %1 = arith.muli %0, %c3_i32 : i32
    %c0_i32 = arith.constant 0 : i32
    %c0_i32_0 = arith.constant 0 : i32
    return %c0_i32, %1 : i32, i32
  }
  func.func @transform_4(%arg0: i32) -> (i32, i32) {
    %c0_i32 = arith.constant 0 : i32
    %c0_i32_0 = arith.constant 0 : i32
    return %c0_i32, %arg0 : i32, i32
  }
}

module attributes {stable_mosaic.version = 11 : i64} {
  func.func @_conv_taps_kernel(%arg0: i32, %arg1: memref<9x8x8xbf16, #tpu.memory_space<vmem>>, %arg2: memref<8x1xf32, #tpu.memory_space<vmem>>, %arg3: memref<8x384xbf16, #tpu.memory_space<vmem>>, %arg4: memref<8x128xbf16, #tpu.memory_space<vmem>>, %arg5: memref<8x384xf32, #tpu.memory_space<vmem>>, %arg6: memref<8x512xbf16, #tpu.memory_space<vmem>>) attributes {dimension_semantics = [#tpu.dimension_semantics<parallel>], iteration_bounds = array<i64: 2>, scalar_prefetch = 0 : i64, scratch_operands = 1 : i64, tpu.core_type = #tpu.core_type<tc>, window_params = [{pipeline_mode = #tpu.pipeline_mode<synchronous>, transform_indices = @transform_0, window_bounds = array<i64: 9, 8, 8>}, {pipeline_mode = #tpu.pipeline_mode<synchronous>, transform_indices = @transform_1, window_bounds = array<i64: 8, 1>}, {transform_indices = @transform_2, window_bounds = array<i64: 8, 384>}, {transform_indices = @transform_3, window_bounds = array<i64: 8, 128>}, {transform_indices = @transform_4, window_bounds = array<i64: 8, 384>}]} {
    %c0 = arith.constant 0 : index
    %c0_0 = arith.constant 0 : index
    %0 = vector.load %arg3[%c0, %c0_0] : memref<8x384xbf16, #tpu.memory_space<vmem>>, vector<8x384xbf16>
    %c0_1 = arith.constant 0 : index
    %c0_2 = arith.constant 0 : index
    %1 = vector.load %arg6[%c0_1, %c0_2] : memref<8x512xbf16, #tpu.memory_space<vmem>>, vector<8x384xbf16>
    tpu.vector_store %arg6[%c0_1, %c0_2], %0 {strides = array<i32>} : memref<8x512xbf16, #tpu.memory_space<vmem>>, vector<8x384xbf16>,
    %c0_3 = arith.constant 0 : index
    %c0_4 = arith.constant 0 : index
    %2 = vector.load %arg4[%c0_3, %c0_4] : memref<8x128xbf16, #tpu.memory_space<vmem>>, vector<8x128xbf16>
    %c0_5 = arith.constant 0 : index
    %c384 = arith.constant 384 : index
    %3 = vector.load %arg6[%c0_5, %c384] : memref<8x512xbf16, #tpu.memory_space<vmem>>, vector<8x128xbf16>
    tpu.vector_store %arg6[%c0_5, %c384], %2 {strides = array<i32>} : memref<8x512xbf16, #tpu.memory_space<vmem>>, vector<8x128xbf16>,
    %c0_6 = arith.constant 0 : index
    %c0_7 = arith.constant 0 : index
    %c0_8 = arith.constant 0 : index
    %4 = vector.load %arg1[%c0_6, %c0_7, %c0_8] : memref<9x8x8xbf16, #tpu.memory_space<vmem>>, vector<1x8x8xbf16>
    %5 = vector.shape_cast %4 : vector<1x8x8xbf16> to vector<8x8xbf16>
    %c0_9 = arith.constant 0 : index
    %c0_10 = arith.constant 0 : index
    %6 = vector.load %arg6[%c0_9, %c0_10] : memref<8x512xbf16, #tpu.memory_space<vmem>>, vector<8x384xbf16>
    %cst = arith.constant dense<0.000000e+00> : vector<8x384xf32>
    %7 = tpu.matmul %5, %6, %cst {dimension_numbers = #tpu.dot_dimension_numbers<[1], [0], [0], [1], [0, 0, 1, 1], [], []>} : vector<8x8xbf16>, vector<8x384xbf16>, vector<8x384xf32> -> vector<8x384xf32>
    %c1 = arith.constant 1 : index
    %c0_11 = arith.constant 0 : index
    %c0_12 = arith.constant 0 : index
    %8 = vector.load %arg1[%c1, %c0_11, %c0_12] : memref<9x8x8xbf16, #tpu.memory_space<vmem>>, vector<1x8x8xbf16>
    %9 = vector.shape_cast %8 : vector<1x8x8xbf16> to vector<8x8xbf16>
    %c0_13 = arith.constant 0 : index
    %c1_14 = arith.constant 1 : index
    %10 = vector.load %arg6[%c0_13, %c1_14] : memref<8x512xbf16, #tpu.memory_space<vmem>>, vector<8x384xbf16>
    %cst_15 = arith.constant dense<0.000000e+00> : vector<8x384xf32>
    %11 = tpu.matmul %9, %10, %cst_15 {dimension_numbers = #tpu.dot_dimension_numbers<[1], [0], [0], [1], [0, 0, 1, 1], [], []>} : vector<8x8xbf16>, vector<8x384xbf16>, vector<8x384xf32> -> vector<8x384xf32>
    %12 = arith.addf %7, %11 : vector<8x384xf32>
    %c2 = arith.constant 2 : index
    %c0_16 = arith.constant 0 : index
    %c0_17 = arith.constant 0 : index
    %13 = vector.load %arg1[%c2, %c0_16, %c0_17] : memref<9x8x8xbf16, #tpu.memory_space<vmem>>, vector<1x8x8xbf16>
    %14 = vector.shape_cast %13 : vector<1x8x8xbf16> to vector<8x8xbf16>
    %c0_18 = arith.constant 0 : index
    %c2_19 = arith.constant 2 : index
    %15 = vector.load %arg6[%c0_18, %c2_19] : memref<8x512xbf16, #tpu.memory_space<vmem>>, vector<8x384xbf16>
    %cst_20 = arith.constant dense<0.000000e+00> : vector<8x384xf32>
    %16 = tpu.matmul %14, %15, %cst_20 {dimension_numbers = #tpu.dot_dimension_numbers<[1], [0], [0], [1], [0, 0, 1, 1], [], []>} : vector<8x8xbf16>, vector<8x384xbf16>, vector<8x384xf32> -> vector<8x384xf32>
    %17 = arith.addf %12, %16 : vector<8x384xf32>
    %c3 = arith.constant 3 : index
    %c0_21 = arith.constant 0 : index
    %c0_22 = arith.constant 0 : index
    %18 = vector.load %arg1[%c3, %c0_21, %c0_22] : memref<9x8x8xbf16, #tpu.memory_space<vmem>>, vector<1x8x8xbf16>
    %19 = vector.shape_cast %18 : vector<1x8x8xbf16> to vector<8x8xbf16>
    %c0_23 = arith.constant 0 : index
    %c18 = arith.constant 18 : index
    %20 = vector.load %arg6[%c0_23, %c18] : memref<8x512xbf16, #tpu.memory_space<vmem>>, vector<8x384xbf16>
    %cst_24 = arith.constant dense<0.000000e+00> : vector<8x384xf32>
    %21 = tpu.matmul %19, %20, %cst_24 {dimension_numbers = #tpu.dot_dimension_numbers<[1], [0], [0], [1], [0, 0, 1, 1], [], []>} : vector<8x8xbf16>, vector<8x384xbf16>, vector<8x384xf32> -> vector<8x384xf32>
    %22 = arith.addf %17, %21 : vector<8x384xf32>
    %c4 = arith.constant 4 : index
    %c0_25 = arith.constant 0 : index
    %c0_26 = arith.constant 0 : index
    %23 = vector.load %arg1[%c4, %c0_25, %c0_26] : memref<9x8x8xbf16, #tpu.memory_space<vmem>>, vector<1x8x8xbf16>
    %24 = vector.shape_cast %23 : vector<1x8x8xbf16> to vector<8x8xbf16>
    %c0_27 = arith.constant 0 : index
    %c19 = arith.constant 19 : index
    %25 = vector.load %arg6[%c0_27, %c19] : memref<8x512xbf16, #tpu.memory_space<vmem>>, vector<8x384xbf16>
    %cst_28 = arith.constant dense<0.000000e+00> : vector<8x384xf32>
    %26 = tpu.matmul %24, %25, %cst_28 {dimension_numbers = #tpu.dot_dimension_numbers<[1], [0], [0], [1], [0, 0, 1, 1], [], []>} : vector<8x8xbf16>, vector<8x384xbf16>, vector<8x384xf32> -> vector<8x384xf32>
    %27 = arith.addf %22, %26 : vector<8x384xf32>
    %c5 = arith.constant 5 : index
    %c0_29 = arith.constant 0 : index
    %c0_30 = arith.constant 0 : index
    %28 = vector.load %arg1[%c5, %c0_29, %c0_30] : memref<9x8x8xbf16, #tpu.memory_space<vmem>>, vector<1x8x8xbf16>
    %29 = vector.shape_cast %28 : vector<1x8x8xbf16> to vector<8x8xbf16>
    %c0_31 = arith.constant 0 : index
    %c20 = arith.constant 20 : index
    %30 = vector.load %arg6[%c0_31, %c20] : memref<8x512xbf16, #tpu.memory_space<vmem>>, vector<8x384xbf16>
    %cst_32 = arith.constant dense<0.000000e+00> : vector<8x384xf32>
    %31 = tpu.matmul %29, %30, %cst_32 {dimension_numbers = #tpu.dot_dimension_numbers<[1], [0], [0], [1], [0, 0, 1, 1], [], []>} : vector<8x8xbf16>, vector<8x384xbf16>, vector<8x384xf32> -> vector<8x384xf32>
    %32 = arith.addf %27, %31 : vector<8x384xf32>
    %c6 = arith.constant 6 : index
    %c0_33 = arith.constant 0 : index
    %c0_34 = arith.constant 0 : index
    %33 = vector.load %arg1[%c6, %c0_33, %c0_34] : memref<9x8x8xbf16, #tpu.memory_space<vmem>>, vector<1x8x8xbf16>
    %34 = vector.shape_cast %33 : vector<1x8x8xbf16> to vector<8x8xbf16>
    %c0_35 = arith.constant 0 : index
    %c36 = arith.constant 36 : index
    %35 = vector.load %arg6[%c0_35, %c36] : memref<8x512xbf16, #tpu.memory_space<vmem>>, vector<8x384xbf16>
    %cst_36 = arith.constant dense<0.000000e+00> : vector<8x384xf32>
    %36 = tpu.matmul %34, %35, %cst_36 {dimension_numbers = #tpu.dot_dimension_numbers<[1], [0], [0], [1], [0, 0, 1, 1], [], []>} : vector<8x8xbf16>, vector<8x384xbf16>, vector<8x384xf32> -> vector<8x384xf32>
    %37 = arith.addf %32, %36 : vector<8x384xf32>
    %c7 = arith.constant 7 : index
    %c0_37 = arith.constant 0 : index
    %c0_38 = arith.constant 0 : index
    %38 = vector.load %arg1[%c7, %c0_37, %c0_38] : memref<9x8x8xbf16, #tpu.memory_space<vmem>>, vector<1x8x8xbf16>
    %39 = vector.shape_cast %38 : vector<1x8x8xbf16> to vector<8x8xbf16>
    %c0_39 = arith.constant 0 : index
    %c37 = arith.constant 37 : index
    %40 = vector.load %arg6[%c0_39, %c37] : memref<8x512xbf16, #tpu.memory_space<vmem>>, vector<8x384xbf16>
    %cst_40 = arith.constant dense<0.000000e+00> : vector<8x384xf32>
    %41 = tpu.matmul %39, %40, %cst_40 {dimension_numbers = #tpu.dot_dimension_numbers<[1], [0], [0], [1], [0, 0, 1, 1], [], []>} : vector<8x8xbf16>, vector<8x384xbf16>, vector<8x384xf32> -> vector<8x384xf32>
    %42 = arith.addf %37, %41 : vector<8x384xf32>
    %c8 = arith.constant 8 : index
    %c0_41 = arith.constant 0 : index
    %c0_42 = arith.constant 0 : index
    %43 = vector.load %arg1[%c8, %c0_41, %c0_42] : memref<9x8x8xbf16, #tpu.memory_space<vmem>>, vector<1x8x8xbf16>
    %44 = vector.shape_cast %43 : vector<1x8x8xbf16> to vector<8x8xbf16>
    %c0_43 = arith.constant 0 : index
    %c38 = arith.constant 38 : index
    %45 = vector.load %arg6[%c0_43, %c38] : memref<8x512xbf16, #tpu.memory_space<vmem>>, vector<8x384xbf16>
    %cst_44 = arith.constant dense<0.000000e+00> : vector<8x384xf32>
    %46 = tpu.matmul %44, %45, %cst_44 {dimension_numbers = #tpu.dot_dimension_numbers<[1], [0], [0], [1], [0, 0, 1, 1], [], []>} : vector<8x8xbf16>, vector<8x384xbf16>, vector<8x384xf32> -> vector<8x384xf32>
    %47 = arith.addf %42, %46 : vector<8x384xf32>
    %c0_45 = arith.constant 0 : index
    %c0_46 = arith.constant 0 : index
    %48 = vector.load %arg2[%c0_45, %c0_46] : memref<8x1xf32, #tpu.memory_space<vmem>>, vector<8x1xf32>
    %49 = vector.broadcast %48 : vector<8x1xf32> to vector<8x384xf32>
    %50 = arith.addf %47, %49 : vector<8x384xf32>
    %cst_47 = arith.constant 0.000000e+00 : f32
    %51 = vector.broadcast %cst_47 : f32 to vector<8x384xf32>
    %52 = arith.cmpf oge, %50, %51 : vector<8x384xf32>
    %cst_48 = arith.constant 2.000000e-01 : f32
    %53 = vector.broadcast %cst_48 : f32 to vector<8x384xf32>
    %54 = arith.mulf %53, %50 : vector<8x384xf32>
    %55 = arith.select %52, %50, %54 : vector<8x384xi1>, vector<8x384xf32>
    %c0_49 = arith.constant 0 : index
    %c0_50 = arith.constant 0 : index
    %56 = vector.load %arg5[%c0_49, %c0_50] : memref<8x384xf32, #tpu.memory_space<vmem>>, vector<8x384xf32>
    tpu.vector_store %arg5[%c0_49, %c0_50], %55 {strides = array<i32>} : memref<8x384xf32, #tpu.memory_space<vmem>>, vector<8x384xf32>,
    return
  }
  func.func @transform_0(%arg0: i32) -> (i32, i32, i32) {
    %c0_i32 = arith.constant 0 : i32
    %c0_i32_0 = arith.constant 0 : i32
    %c0_i32_1 = arith.constant 0 : i32
    %c0_i32_2 = arith.constant 0 : i32
    return %c0_i32, %c0_i32_0, %c0_i32_1 : i32, i32, i32
  }
  func.func @transform_1(%arg0: i32) -> (i32, i32) {
    %c0_i32 = arith.constant 0 : i32
    %c0_i32_0 = arith.constant 0 : i32
    %c0_i32_1 = arith.constant 0 : i32
    return %c0_i32, %c0_i32_0 : i32, i32
  }
  func.func @transform_2(%arg0: i32) -> (i32, i32) {
    %c0_i32 = arith.constant 0 : i32
    %c0_i32_0 = arith.constant 0 : i32
    return %c0_i32, %arg0 : i32, i32
  }
  func.func @transform_3(%arg0: i32) -> (i32, i32) {
    %c1_i32 = arith.constant 1 : i32
    %0 = arith.addi %arg0, %c1_i32 : i32
    %c3_i32 = arith.constant 3 : i32
    %1 = arith.muli %0, %c3_i32 : i32
    %c0_i32 = arith.constant 0 : i32
    %c0_i32_0 = arith.constant 0 : i32
    return %c0_i32, %1 : i32, i32
  }
  func.func @transform_4(%arg0: i32) -> (i32, i32) {
    %c0_i32 = arith.constant 0 : i32
    %c0_i32_0 = arith.constant 0 : i32
    return %c0_i32, %arg0 : i32, i32
  }
}

</mosaic_0001>

<bundles_post_ra>
// kernel: a_call__.2
= control target key start
LH: loop header
LB: loop body
LE: loop exit
PB: predicated region body
PF: predicated region fallthrough
CT: control target
= control target key end

     0   :  { %s1690_s15 = smov 0   ;;  %s1834_s0 = inlined_call_operand.vmem [shape: bf16[9,8,4], index: 0, kind: input, shape index: {}]   ;;  %s1835_s1 = inlined_call_operand.vmem [shape: f32[8,1], index: 1, kind: input, shape index: {}]   ;;  %s1836_s2 = inlined_call_operand.vmem [shape: bf16[4,896], index: 2, kind: input, shape index: {}, may-alias: {2,3}]   ;;  %s1837_s3 = inlined_call_operand.vmem [shape: bf16[4,896], index: 3, kind: input, shape index: {}, may-alias: {2,3}]   ;;  %s1838_s4 = inlined_call_operand.vmem [shape: bf16[8,768], index: 4, kind: output, shape index: {}]  }
   0x1 LB: > { %s1501_s16 = sadd.s32 4294967295, %s1651_s15   ;;  %p1505_p0 = scmp.ge.s32.totalorder %s1651_s15, 1  ;;  %s1651_s15 = sphi %s1690_s15, %s14_s15  }
   0x2   : > { %p188_p1 = scmp.lt.s32.totalorder %s1651_s15, 3 }
   0x4   : > { %p189_p2 = pnand %p1505_p0, %p188_p1 }
   0x5   : > { %s1698_s17 = smul.u32 (!%p189_p2), 3, %s1501_s16  ;;  %s238_s18 = sadd.s32 (!%p189_p2), 1, %s1501_s16  ;;  %v1653_v0 = vmov (!%p189_p2), 1983009808   ;;  %v267_v2 = vlaneseq (!%p189_p2)  ;;  %v1654_v8 = vmov (!%p189_p2), 0.0   ;;  %v1655_v9 = vmov (!%p189_p2), 0  }
   0x6   : > { %192 = sbr.rel (%p189_p2) target bundleno = 441 (0x1b9), region = 36  ;;  %v265_v1 = vunpack.c.l.s4 (!%p189_p2), %v1653_v0  ;;  %1568 = vmatprep.subr.bf16.mxu1 (!%p189_p2), %v1654_v8  ;;  %338 = vmatprep.mubr.bf16.mxu0 (!%p189_p2), %v1655_v9  ;;  %vm1656_vm0 = vmmov (!%p189_p2), 0   ;;  %s1657_s29 = smov (!%p189_p2), 127   ;;  %v1400_v16 = vld [vmem:[%s1835_s1] sm:$0xff] (!%p189_p2)  ;;  %vm288_vm1 = vcmask (!%p189_p2), 1039360   ;;  %vm296_vm2 = vcmask (!%p189_p2), 1041408  }
   0x7   : > { %s239_s19 = smul.u32 (!%p189_p2), 3, %s238_s18  ;;  %p229_p3 = scmp.lt.s32.totalorder (!%p189_p2), %s1698_s17, 6  ;;  %v268_v6 = vshrl.u32 (!%p189_p2), %v267_v2, 7  ;;  %1642 = vset.pattern.permute.xlu0 (!%p189_p2), %v1655_v9  ;;  %1570 = vmatprep.mubr.msk.bf16.mxu1 (!%p189_p2), %vm1656_vm0, %v1654_v8  ;;  %v1509_v30 = vld [vmem:[%s1834_s0 + $0x4] sm:$0xf] (!%p189_p2)  ;;  %vm292_vm3 = vcmask (!%p189_p2), 31744  }
   0x8   : > { %v266_v5 = vunpack.c.0.s8 (!%p189_p2), %v265_v1  ;;  %s1658_s30 = smov (!%p189_p2), 126   ;;  %s1659_s5 = smov (!%p189_p2), 110   ;;  %vm526_vm4 = vcmask (!%p189_p2), 1031168   ;;  %v257_v41 = vld [vmem:[%s1834_s0] sm:$0xf] (!%p189_p2)  ;;  %vm655_vm5 = vcmask (!%p189_p2), 900096  }
   0x9   : > { %p240_p4 = scmp.lt.s32.totalorder (!%p189_p2), %s239_s19, 6  ;;  %s1660_s6 = smov (!%p189_p2), 109   ;;  %v1516_v51 = vld [vmem:[%s1834_s0 + $0x8] sm:$0xf] (!%p189_p2)  ;;  %vm784_vm6 = vcmask (!%p189_p2), 891904   ;;  %vm913_vm7 = vcmask (!%p189_p2), 883712  }
   0xa   : > { %v1708_v7 = vsub.s32 (!%p189_p2), %v266_v5, %v268_v6  ;;  %s1661_s7 = smov (!%p189_p2), 108   ;;  %s1662_s8 = smov (!%p189_p2), 92   ;;  %v1520_v61 = vld [vmem:[%s1834_s0 + $0xc] sm:$0xf] (!%p189_p2)  ;;  %vm1042_vm8 = vcmask (!%p189_p2), 752640   ;;  %vm1171_vm9 = vcmask (!%p189_p2), 744448  }
   0xb   : > { %s1663_s9 = smov (!%p189_p2), 91   ;;  %s1664_s10 = smov (!%p189_p2), 90   ;;  %vm1300_vm10 = vcmask (!%p189_p2), 736256  }
   0xc   : > { %p247_p5 = scmp.lt.s32.totalorder (!%p189_p2), %s1698_s17, 5 }
   0xd   : > { %s230_s20 = scalar_select %p229_p3, %s1698_s17, 6 }
   0xe   : > { %s1840_s19 = smov (!%p240_p4, %s239_s19), 6  ;;  %s1842_s17 = smov (!%p247_p5, %s1698_s17), 5 }
   0xf   : > { %s1506_s21 = sshll.u32 %s230_s20, 1  ;;  %s1507_s25 = sshll.u32 %s1840_s19, 1 }
  0x10   : > { %s232_s24 = scalar_lea.vmem %s1836_s2, %s1506_s21  ;;  %s243_s28 = scalar_lea.vmem %s1837_s3, %s1507_s25 }
  0x11   : > { %v253_v3 = vld [vmem:[%s232_s24] sm:$0x3f] }
  0x12   : > { %254 = vst [vmem:[#allocation2] sm:$0x3f] %v253_v3  ;;  %v255_v4 = vld [vmem:[%s243_s28] sm:$0x3] }
  0x13   : > { %256 = vst [vmem:[#allocation2 + $0x6] sm:$0x3] %v255_v4 }
  0x19   : > { %v258_v17 = vld [vmem:[#allocation2] sm:$0x3f] }
  0x1a   : > { %v261_v10 = vld [vmem:[#allocation2] sm:$0xff]  ;;  %v395_v19 = vrot.slane %v258_v17, %v1708_v7  ;;  %v388_v21 = vcombine.high %v258_v17, %v258_v17 }
  0x1b   : > { %v270_v11 = vrot.slane %v261_v10, %v1708_v7  ;;  %v263_v12 = vcombine.high %v261_v10, %v261_v10 }
  0x1c   : > { %v403_v23 = vcombine.high %v395_v19, %v395_v19  ;;  %v402_v28 = vrot.slane %v388_v21, %v1708_v7  ;;  %v408_v33 = vsel %vm296_vm2, %v395_v19, 0  ;;  %v1528_v19 = vld [vmem:[%s1834_s0 + $0x14] sm:$0xf] }
  0x1d   : > { %280 = vrot.lane.b32.xlu0 %v270_v11, %s1657_s29  ;;  %v278_v13 = vcombine.high %v270_v11, %v270_v11  ;;  %v277_v14 = vrot.slane %v263_v12, %v1708_v7  ;;  %v1524_v7 = vld [vmem:[%s1834_s0 + $0x10] sm:$0xf] }
  0x1e   : > { %v414_v35 = vsel %vm296_vm2, %v402_v28, 0 }
  0x1f   : > { %284 = vrot.lane.b32.xlu1 %v277_v14, %s1657_s29  ;;  %v279_v15 = vcombine.high %v277_v14, %v277_v14 }
  0x21   : > { %282 = vrot.lane.b32.xlu0 %v278_v13, %s1657_s29 }
  0x23   : > { %286 = vrot.lane.b32.xlu1 %v279_v15, %s1657_s29 }
  0x25   : > { %518 = vrot.lane.b32.xlu0 %v270_v11, %s1658_s30 }
  0x27   : > { %520 = vrot.lane.b32.xlu1 %v278_v13, %s1658_s30 }
  0x29   : > { %522 = vrot.lane.b32.xlu0 %v277_v14, %s1658_s30 }
  0x2b   : > { %524 = vrot.lane.b32.xlu1 %v279_v15, %s1658_s30 }
  0x2d   : > { %647 = vrot.lane.b32.xlu0 %v270_v11, %s1659_s5 }
  0x2f   : > { %649 = vrot.lane.b32.xlu1 %v278_v13, %s1659_s5 }
  0x31   : > { %651 = vrot.lane.b32.xlu0 %v277_v14, %s1659_s5 }
  0x33   : > { %653 = vrot.lane.b32.xlu1 %v279_v15, %s1659_s5 }
  0x35   : > { %776 = vrot.lane.b32.xlu0 %v270_v11, %s1660_s6 }
  0x37   : > { %778 = vrot.lane.b32.xlu1 %v278_v13, %s1660_s6 }
  0x39   : > { %780 = vrot.lane.b32.xlu0 %v277_v14, %s1660_s6 }
  0x3b   : > { %782 = vrot.lane.b32.xlu1 %v279_v15, %s1660_s6 }
  0x3d   : > { %905 = vrot.lane.b32.xlu0 %v270_v11, %s1661_s7 }
  0x3f   : > { %907 = vrot.lane.b32.xlu1 %v278_v13, %s1661_s7 }
  0x41   : > { %909 = vrot.lane.b32.xlu0 %v277_v14, %s1661_s7 }
  0x43   : > { %911 = vrot.lane.b32.xlu1 %v279_v15, %s1661_s7  ;;  %s1508_s7 = sshll.u32 %s1842_s17, 2 }
  0x45   : > { %1034 = vrot.lane.b32.xlu0 %v270_v11, %s1662_s8 }
  0x47   : > { %1036 = vrot.lane.b32.xlu1 %v278_v13, %s1662_s8 }
  0x49   : > { %1038 = vrot.lane.b32.xlu0 %v277_v14, %s1662_s8 }
  0x4b   : > { %1040 = vrot.lane.b32.xlu1 %v279_v15, %s1662_s8 }
  0x4d   : > { %1163 = vrot.lane.b32.xlu0 %v270_v11, %s1663_s9 }
  0x4f   : > { %1165 = vrot.lane.b32.xlu1 %v278_v13, %s1663_s9 }
  0x51   : > { %1167 = vrot.lane.b32.xlu0 %v277_v14, %s1663_s9 }
  0x53   : > { %1169 = vrot.lane.b32.xlu1 %v279_v15, %s1663_s9 }
  0x55   : > { %1292 = vrot.lane.b32.xlu0 %v270_v11, %s1664_s10 }
  0x57   : > { %1294 = vrot.lane.b32.xlu1 %v278_v13, %s1664_s10 }
  0x59   : > { %1296 = vrot.lane.b32.xlu0 %v277_v14, %s1664_s10 }
  0x5b   : > { %1298 = vrot.lane.b32.xlu1 %v279_v15, %s1664_s10  ;;  %s250_s10 = scalar_lea.vmem %s1838_s4, %s1508_s7 }
  0x5d   : > { %1403 = vperm.xlu0 %1642, %v1400_v16  }
  0x8f   : > { %v281_v18 = vpop.permute.xlu0 %280 }
  0x91   : > { %v285_v20 = vpop.permute.xlu1 %284 }
  0x93   : > { %v283_v22 = vpop.permute.xlu0 %282 }
  0x94   : > { %v290_v24 = vsel %vm288_vm1, %v283_v22, %v285_v20  ;;  %v289_v25 = vsel %vm288_vm1, %v281_v18, %v283_v22 }
  0x95   : > { %1510 = vmatprep.subr.msk.bf16.mxu0 %vm296_vm2, %v290_v24  ;;  %v287_v26 = vpop.permute.xlu1 %286  ;;  %v298_v27 = vsel %vm296_vm2, %v289_v25, 0 }
  0x96   : > { %307 = vmatpush1.bf16.msra.mxu0 %v298_v27  ;;  %v291_v29 = vsel %vm288_vm1, %v285_v20, %v287_v26 }
  0x97   : > { %v304_v31 = vsel %vm296_vm2, %v291_v29, 0  ;;  %v519_v32 = vpop.permute.xlu0 %518  ;;  %1513 = vmatprep.subr.msk.bf16.mxu0 %vm296_vm2, %v403_v23  ;;  %v1532_v29 = vld [vmem:[%s1834_s0 + $0x18] sm:$0xf] }
  0x98   : > { %1569 = vmatpush3.bf16.msra.mxu1 %v304_v31 }
  0x99   : > { %1511 = vmatmul.mubr.msk.bf16.vlgmr.msra.gmra.mrb[0].mxu0 %vm292_vm3, %v1509_v30  ;;  %1574 = vmatprep.subr.bf16.mxu1 %v1654_v8  ;;  %v521_v34 = vpop.permute.xlu1 %520 }
  0x9a   : > { %417 = vmatpush1.bf16.msra.mxu0 %v408_v33  ;;  %448 = vmatprep.mubr.bf16.mxu0 %v1655_v9  ;;  %v527_v37 = vsel %vm526_vm4, %v519_v32, %v521_v34 }
  0x9b   : > { %1571 = vmatmul.mubr.msk.bf16.vlgmr.msra.gmra.mrb[0].mxu1 %vm292_vm3, %v1509_v30  ;;  %v523_v36 = vpop.permute.xlu0 %522  ;;  %v534_v42 = vsel %vm296_vm2, %v527_v37, 0 }
  0x9c   : > { %1575 = vmatpush3.bf16.msra.mxu1 %v414_v35  ;;  %v528_v38 = vsel %vm526_vm4, %v521_v34, %v523_v36  ;;  %1576 = vmatprep.mubr.msk.bf16.mxu1 %vm1656_vm0, %v1654_v8 }
  0x9d   : > { %1517 = vmatprep.subr.msk.bf16.mxu0 %vm296_vm2, %v528_v38  ;;  %v525_v39 = vpop.permute.xlu1 %524  ;;  %1580 = vmatprep.subr.bf16.mxu1 %v1654_v8 }
  0x9e   : > { %v529_v40 = vsel %vm526_vm4, %v523_v36, %v525_v39  ;;  %v1536_v39 = vld [vmem:[%s1834_s0 + $0x1c] sm:$0xf] }
  0x9f   : > { %v648_v43 = vpop.permute.xlu0 %647  ;;  %v540_v44 = vsel %vm296_vm2, %v529_v40, 0 }
  0xa1   : > { %1514 = vmatmul.mubr.msk.bf16.vlgmr.msra.gmra.mrb[4].mxu0 %vm292_vm3, %v257_v41  ;;  %v650_v45 = vpop.permute.xlu1 %649 }
  0xa2   : > { %543 = vmatpush1.bf16.msra.mxu0 %v534_v42  ;;  %574 = vmatprep.mubr.bf16.mxu0 %v1655_v9  ;;  %v656_v47 = vsel %vm655_vm5, %v648_v43, %v650_v45  ;;  %v1540_v42 = vld [vmem:[%s1834_s0 + $0x20] sm:$0xf] }
  0xa3   : > { %1577 = vmatmul.mubr.msk.bf16.vlgmr.msra.gmra.mrb[4].mxu1 %vm292_vm3, %v257_v41  ;;  %v652_v46 = vpop.permute.xlu0 %651  ;;  %v663_v52 = vsel %vm296_vm2, %v656_v47, 0 }
  0xa4   : > { %1581 = vmatpush3.bf16.msra.mxu1 %v540_v44  ;;  %v657_v48 = vsel %vm655_vm5, %v650_v45, %v652_v46  ;;  %1582 = vmatprep.mubr.msk.bf16.mxu1 %vm1656_vm0, %v1654_v8 }
  0xa5   : > { %1521 = vmatprep.subr.msk.bf16.mxu0 %vm296_vm2, %v657_v48  ;;  %v654_v49 = vpop.permute.xlu1 %653  ;;  %1586 = vmatprep.subr.bf16.mxu1 %v1654_v8 }
  0xa6   : > { %v658_v50 = vsel %vm655_vm5, %v652_v46, %v654_v49 }
  0xa7   : > { %v777_v53 = vpop.permute.xlu0 %776  ;;  %v669_v54 = vsel %vm296_vm2, %v658_v50, 0 }
  0xa9   : > { %1518 = vmatmul.mubr.msk.bf16.vlgmr.msra.gmra.mrb[8].mxu0 %vm292_vm3, %v1516_v51  ;;  %v779_v55 = vpop.permute.xlu1 %778 }
  0xaa   : > { %672 = vmatpush1.bf16.msra.mxu0 %v663_v52  ;;  %703 = vmatprep.mubr.bf16.mxu0 %v1655_v9  ;;  %v785_v57 = vsel %vm784_vm6, %v777_v53, %v779_v55 }
  0xab   : > { %1583 = vmatmul.mubr.msk.bf16.vlgmr.msra.gmra.mrb[8].mxu1 %vm292_vm3, %v1516_v51  ;;  %v781_v56 = vpop.permute.xlu0 %780  ;;  %v792_v62 = vsel %vm296_vm2, %v785_v57, 0 }
  0xac   : > { %1587 = vmatpush3.bf16.msra.mxu1 %v669_v54  ;;  %v786_v58 = vsel %vm784_vm6, %v779_v55, %v781_v56  ;;  %1588 = vmatprep.mubr.msk.bf16.mxu1 %vm1656_vm0, %v1654_v8 }
  0xad   : > { %1525 = vmatprep.subr.msk.bf16.mxu0 %vm296_vm2, %v786_v58  ;;  %v783_v59 = vpop.permute.xlu1 %782  ;;  %1592 = vmatprep.subr.bf16.mxu1 %v1654_v8 }
  0xae   : > { %v787_v60 = vsel %vm784_vm6, %v781_v56, %v783_v59 }
  0xaf   : > { %v906_v63 = vpop.permute.xlu0 %905  ;;  %v798_v0 = vsel %vm296_vm2, %v787_v60, 0 }
  0xb1   : > { %1522 = vmatmul.mubr.msk.bf16.vlgmr.msra.gmra.mrb[12].mxu0 %vm292_vm3, %v1520_v61  ;;  %v908_v1 = vpop.permute.xlu1 %907 }
  0xb2   : > { %801 = vmatpush1.bf16.msra.mxu0 %v792_v62  ;;  %832 = vmatprep.mubr.bf16.mxu0 %v1655_v9  ;;  %v914_v3 = vsel %vm913_vm7, %v906_v63, %v908_v1 }
  0xb3   : > { %1589 = vmatmul.mubr.msk.bf16.vlgmr.msra.gmra.mrb[12].mxu1 %vm292_vm3, %v1520_v61  ;;  %v910_v2 = vpop.permute.xlu0 %909  ;;  %v921_v10 = vsel %vm296_vm2, %v914_v3, 0 }
  0xb4   : > { %1593 = vmatpush3.bf16.msra.mxu1 %v798_v0  ;;  %v915_v4 = vsel %vm913_vm7, %v908_v1, %v910_v2  ;;  %1594 = vmatprep.mubr.msk.bf16.mxu1 %vm1656_vm0, %v1654_v8 }
  0xb5   : > { %1529 = vmatprep.subr.msk.bf16.mxu0 %vm296_vm2, %v915_v4  ;;  %v912_v5 = vpop.permute.xlu1 %911  ;;  %1598 = vmatprep.subr.bf16.mxu1 %v1654_v8 }
  0xb6   : > { %v916_v6 = vsel %vm913_vm7, %v910_v2, %v912_v5 }
  0xb7   : > { %v1035_v11 = vpop.permute.xlu0 %1034  ;;  %v927_v12 = vsel %vm296_vm2, %v916_v6, 0 }
  0xb9   : > { %1526 = vmatmul.mubr.msk.bf16.vlgmr.msra.gmra.mrb[16].mxu0 %vm292_vm3, %v1524_v7  ;;  %v1037_v13 = vpop.permute.xlu1 %1036 }
  0xba   : > { %930 = vmatpush1.bf16.msra.mxu0 %v921_v10  ;;  %961 = vmatprep.mubr.bf16.mxu0 %v1655_v9  ;;  %v1043_v15 = vsel %vm1042_vm8, %v1035_v11, %v1037_v13 }
  0xbb   : > { %1595 = vmatmul.mubr.msk.bf16.vlgmr.msra.gmra.mrb[16].mxu1 %vm292_vm3, %v1524_v7  ;;  %v1039_v14 = vpop.permute.xlu0 %1038  ;;  %v1050_v20 = vsel %vm296_vm2, %v1043_v15, 0 }
  0xbc   : > { %1599 = vmatpush3.bf16.msra.mxu1 %v927_v12  ;;  %v1044_v16 = vsel %vm1042_vm8, %v1037_v13, %v1039_v14  ;;  %1600 = vmatprep.mubr.msk.bf16.mxu1 %vm1656_vm0, %v1654_v8 }
  0xbd   : > { %1533 = vmatprep.subr.msk.bf16.mxu0 %vm296_vm2, %v1044_v16  ;;  %v1041_v17 = vpop.permute.xlu1 %1040  ;;  %1604 = vmatprep.subr.bf16.mxu1 %v1654_v8 }
  0xbe   : > { %v1045_v18 = vsel %vm1042_vm8, %v1039_v14, %v1041_v17 }
  0xbf   : > { %v1164_v21 = vpop.permute.xlu0 %1163  ;;  %v1056_v22 = vsel %vm296_vm2, %v1045_v18, 0 }
  0xc1   : > { %1530 = vmatmul.mubr.msk.bf16.vlgmr.msra.gmra.mrb[20].mxu0 %vm292_vm3, %v1528_v19  ;;  %v1166_v23 = vpop.permute.xlu1 %1165 }
  0xc2   : > { %1059 = vmatpush1.bf16.msra.mxu0 %v1050_v20  ;;  %1090 = vmatprep.mubr.bf16.mxu0 %v1655_v9  ;;  %v1172_v25 = vsel %vm1171_vm9, %v1164_v21, %v1166_v23 }
  0xc3   : > { %1601 = vmatmul.mubr.msk.bf16.vlgmr.msra.gmra.mrb[20].mxu1 %vm292_vm3, %v1528_v19  ;;  %v1168_v24 = vpop.permute.xlu0 %1167  ;;  %v1179_v30 = vsel %vm296_vm2, %v1172_v25, 0 }
  0xc4   : > { %1605 = vmatpush3.bf16.msra.mxu1 %v1056_v22  ;;  %v1173_v26 = vsel %vm1171_vm9, %v1166_v23, %v1168_v24  ;;  %1606 = vmatprep.mubr.msk.bf16.mxu1 %vm1656_vm0, %v1654_v8 }
  0xc5   : > { %1537 = vmatprep.subr.msk.bf16.mxu0 %vm296_vm2, %v1173_v26  ;;  %v1170_v27 = vpop.permute.xlu1 %1169  ;;  %1610 = vmatprep.subr.bf16.mxu1 %v1654_v8 }
  0xc6   : > { %v1174_v28 = vsel %vm1171_vm9, %v1168_v24, %v1170_v27 }
  0xc7   : > { %v1293_v31 = vpop.permute.xlu0 %1292  ;;  %v1185_v32 = vsel %vm296_vm2, %v1174_v28, 0 }
  0xc9   : > { %1534 = vmatmul.mubr.msk.bf16.vlgmr.msra.gmra.mrb[24].mxu0 %vm292_vm3, %v1532_v29  ;;  %v1295_v33 = vpop.permute.xlu1 %1294 }
  0xca   : > { %1188 = vmatpush1.bf16.msra.mxu0 %v1179_v30  ;;  %1219 = vmatprep.mubr.bf16.mxu0 %v1655_v9  ;;  %v1301_v35 = vsel %vm1300_vm10, %v1293_v31, %v1295_v33 }
  0xcb   : > { %1607 = vmatmul.mubr.msk.bf16.vlgmr.msra.gmra.mrb[24].mxu1 %vm292_vm3, %v1532_v29  ;;  %v1297_v34 = vpop.permute.xlu0 %1296  ;;  %v1308_v40 = vsel %vm296_vm2, %v1301_v35, 0 }
  0xcc   : > { %1611 = vmatpush3.bf16.msra.mxu1 %v1185_v32  ;;  %v1302_v36 = vsel %vm1300_vm10, %v1295_v33, %v1297_v34  ;;  %1612 = vmatprep.mubr.msk.bf16.mxu1 %vm1656_vm0, %v1654_v8 }
  0xcd   : > { %1541 = vmatprep.subr.msk.bf16.mxu0 %vm296_vm2, %v1302_v36  ;;  %v1299_v37 = vpop.permute.xlu1 %1298  ;;  %1616 = vmatprep.subr.bf16.mxu1 %v1654_v8 }
  0xce   : > { %v1303_v38 = vsel %vm1300_vm10, %v1297_v34, %v1299_v37 }
  0xcf   : > { %v1314_v41 = vsel %vm296_vm2, %v1303_v38, 0 }
  0xd1   : > { %1538 = vmatmul.mubr.msk.bf16.vlgmr.msra.gmra.mrb[28].mxu0 %vm292_vm3, %v1536_v39 }
  0xd2   : > { %1317 = vmatpush1.bf16.msra.mxu0 %v1308_v40  ;;  %1348 = vmatprep.mubr.bf16.mxu0 %v1655_v9 }
  0xd3   : > { %1613 = vmatmul.mubr.msk.bf16.vlgmr.msra.gmra.mrb[28].mxu1 %vm292_vm3, %v1536_v39 }
  0xd4   : > { %1617 = vmatpush3.bf16.msra.mxu1 %v1314_v41  ;;  %1618 = vmatprep.mubr.msk.bf16.mxu1 %vm1656_vm0, %v1654_v8 }
  0xd9   : > { %1542 = vmatmul.mubr.msk.bf16.vlgmr.msra.gmra.mrb[32].mxu0 %vm292_vm3, %v1540_v42 }
  0xdb   : > { %1619 = vmatmul.mubr.msk.bf16.vlgmr.msra.gmra.mrb[32].mxu1 %vm292_vm3, %v1540_v42 }
 0x16c   : > { %v340_v43 = vpop.f32.mrb[0].mxu0 }
 0x16d   : > { %v342_v44 = vpop.f32.mrb[1].mxu0 }
 0x16e   : > { %v344_v45 = vpop.f32.mrb[2].mxu0  ;;  %v381_v46 = vpop.f32.mrb[0].mxu1 }
 0x16f   : > { %v345_v47 = vpop.f32.mrb[3].mxu0  ;;  %v1572_v9 = vpop.f32.mrb[1].mxu1 }
 0x170   : > { %v384_v48 = vpop.f32.mrb[2].mxu1 }
 0x171   : > { %v1573_v49 = vpop.f32.mrb[3].mxu1 }
 0x174   : > { %v450_v50 = vpop.f32.mrb[4].mxu0 }
 0x175   : > { %v451_v51 = vadd.f32 %v450_v50, %v340_v43  ;;  %v452_v52 = vpop.f32.mrb[5].mxu0 }
 0x176   : > { %v453_v8 = vadd.f32 %v452_v52, %v342_v44  ;;  %v454_v53 = vpop.f32.mrb[6].mxu0  ;;  %v491_v54 = vpop.f32.mrb[4].mxu1 }
 0x177   : > { %v492_v55 = vadd.f32 %v491_v54, %v381_v46  ;;  %v455_v56 = vpop.f32.mrb[7].mxu0  ;;  %v1578_v57 = vpop.f32.mrb[5].mxu1 }
 0x178   : > { %v494_v58 = vpop.f32.mrb[6].mxu1 }
 0x179   : > { %v1579_v59 = vpop.f32.mrb[7].mxu1 }
 0x17c   : > { %v576_v60 = vpop.f32.mrb[8].mxu0 }
 0x17d   : > { %v623_v61 = vadd.f32 %v576_v60, %v451_v51  ;;  %v578_v62 = vpop.f32.mrb[9].mxu0 }
 0x17e   : > { %v624_v63 = vadd.f32 %v578_v62, %v453_v8  ;;  %v580_v0 = vpop.f32.mrb[10].mxu0  ;;  %v617_v1 = vpop.f32.mrb[8].mxu1 }
 0x17f   : > { %v625_v2 = vadd.f32 %v617_v1, %v492_v55  ;;  %v581_v3 = vpop.f32.mrb[11].mxu0  ;;  %v1584_v4 = vpop.f32.mrb[9].mxu1 }
 0x180   : > { %v620_v5 = vpop.f32.mrb[10].mxu1 }
 0x181   : > { %v1585_v6 = vpop.f32.mrb[11].mxu1 }
 0x184   : > { %v705_v7 = vpop.f32.mrb[12].mxu0 }
 0x185   : > { %v752_v10 = vadd.f32 %v705_v7, %v623_v61  ;;  %v707_v11 = vpop.f32.mrb[13].mxu0 }
 0x186   : > { %v753_v12 = vadd.f32 %v707_v11, %v624_v63  ;;  %v709_v13 = vpop.f32.mrb[14].mxu0  ;;  %v746_v14 = vpop.f32.mrb[12].mxu1 }
 0x187   : > { %v754_v15 = vadd.f32 %v746_v14, %v625_v2  ;;  %v710_v16 = vpop.f32.mrb[15].mxu0  ;;  %v1590_v17 = vpop.f32.mrb[13].mxu1 }
 0x188   : > { %v749_v18 = vpop.f32.mrb[14].mxu1  ;;  %v1404_v63 = vpop.permute.xlu0 %1403 }
 0x189   : > { %v1591_v19 = vpop.f32.mrb[15].mxu1 }
 0x18c   : > { %v834_v20 = vpop.f32.mrb[16].mxu0 }
 0x18d   : > { %v881_v21 = vadd.f32 %v834_v20, %v752_v10  ;;  %v836_v22 = vpop.f32.mrb[17].mxu0 }
 0x18e   : > { %v882_v23 = vadd.f32 %v836_v22, %v753_v12  ;;  %v838_v24 = vpop.f32.mrb[18].mxu0  ;;  %v875_v25 = vpop.f32.mrb[16].mxu1 }
 0x18f   : > { %v883_v26 = vadd.f32 %v875_v25, %v754_v15  ;;  %v839_v27 = vpop.f32.mrb[19].mxu0  ;;  %v1596_v28 = vpop.f32.mrb[17].mxu1 }
 0x190   : > { %v878_v29 = vpop.f32.mrb[18].mxu1 }
 0x191   : > { %v1597_v30 = vpop.f32.mrb[19].mxu1 }
 0x194   : > { %v963_v31 = vpop.f32.mrb[20].mxu0 }
 0x195   : > { %v1010_v32 = vadd.f32 %v963_v31, %v881_v21  ;;  %v965_v33 = vpop.f32.mrb[21].mxu0 }
 0x196   : > { %v1011_v34 = vadd.f32 %v965_v33, %v882_v23  ;;  %v967_v35 = vpop.f32.mrb[22].mxu0  ;;  %v1004_v36 = vpop.f32.mrb[20].mxu1 }
 0x197   : > { %v1012_v37 = vadd.f32 %v1004_v36, %v883_v26  ;;  %v968_v38 = vpop.f32.mrb[23].mxu0  ;;  %v1602_v39 = vpop.f32.mrb[21].mxu1 }
 0x198   : > { %v1007_v40 = vpop.f32.mrb[22].mxu1 }
 0x199   : > { %v1603_v41 = vpop.f32.mrb[23].mxu1 }
 0x19c   : > { %v1092_v42 = vpop.f32.mrb[24].mxu0 }
 0x19d   : > { %v1139_v43 = vadd.f32 %v1092_v42, %v1010_v32  ;;  %v1094_v44 = vpop.f32.mrb[25].mxu0 }
 0x19e   : > { %v1140_v45 = vadd.f32 %v1094_v44, %v1011_v34  ;;  %v1096_v46 = vpop.f32.mrb[26].mxu0  ;;  %v1133_v47 = vpop.f32.mrb[24].mxu1 }
 0x19f   : > { %v1141_v9 = vadd.f32 %v1133_v47, %v1012_v37  ;;  %v1097_v48 = vpop.f32.mrb[27].mxu0  ;;  %v1608_v49 = vpop.f32.mrb[25].mxu1 }
 0x1a0   : > { %v1136_v50 = vpop.f32.mrb[26].mxu1 }
 0x1a1   : > { %v1609_v51 = vpop.f32.mrb[27].mxu1 }
 0x1a4   : > { %v1221_v52 = vpop.f32.mrb[28].mxu0 }
 0x1a5   : > { %v1268_v8 = vadd.f32 %v1221_v52, %v1139_v43  ;;  %v1223_v53 = vpop.f32.mrb[29].mxu0 }
 0x1a6   : > { %v1269_v54 = vadd.f32 %v1223_v53, %v1140_v45  ;;  %v1225_v55 = vpop.f32.mrb[30].mxu0  ;;  %v1262_v56 = vpop.f32.mrb[28].mxu1 }
 0x1a7   : > { %v1270_v57 = vadd.f32 %v1262_v56, %v1141_v9  ;;  %v1226_v58 = vpop.f32.mrb[31].mxu0  ;;  %v1614_v59 = vpop.f32.mrb[29].mxu1 }
 0x1a8   : > { %v1265_v60 = vpop.f32.mrb[30].mxu1 }
 0x1a9   : > { %v1615_v61 = vpop.f32.mrb[31].mxu1 }
 0x1ac   : > { %v1350_v62 = vpop.f32.mrb[32].mxu0 }
 0x1ad   : > { %v1397_v0 = vadd.f32 %v1350_v62, %v1268_v8  ;;  %v1352_v1 = vpop.f32.mrb[33].mxu0 }
 0x1ae   : > { %v1398_v2 = vadd.f32 %v1352_v1, %v1269_v54  ;;  %v1354_v3 = vpop.f32.mrb[34].mxu0  ;;  %v1391_v4 = vpop.f32.mrb[32].mxu1 }
 0x1af   : > { %v1406_v5 = vadd.f32 %v1404_v63, %v1397_v0  ;;  %v1399_v6 = vadd.f32 %v1391_v4, %v1270_v57  ;;  %v1355_v7 = vpop.f32.mrb[35].mxu0  ;;  %v1620_v10 = vpop.f32.mrb[33].mxu1 }
 0x1b0   : > { %v1407_v11 = vadd.f32 %v1404_v63, %v1398_v2  ;;  %v1394_v12 = vpop.f32.mrb[34].mxu1 }
 0x1b1   : > { %vm1409_vm11 = vcmp.ge.f32.partialorder %v1406_v5, 0.0  ;;  %v1412_v13 = vmul.f32 0.2, %v1406_v5  ;;  %v1408_v14 = vadd.f32 %v1404_v63, %v1399_v6  ;;  %v1621_v15 = vpop.f32.mrb[35].mxu1 }
 0x1b2   : > { %vm1410_vm12 = vcmp.ge.f32.partialorder %v1407_v11, 0.0  ;;  %v1413_v16 = vmul.f32 0.2, %v1407_v11 }
 0x1b3   : > { %v1415_v17 = vsel %vm1409_vm11, %v1406_v5, %v1412_v13  ;;  %vm1411_vm13 = vcmp.ge.f32.partialorder %v1408_v14, 0.0  ;;  %v1414_v18 = vmul.f32 0.2, %v1408_v14 }
 0x1b4   : > { %v1416_v19 = vsel %vm1410_vm12, %v1407_v11, %v1413_v16 }
 0x1b5   : > { %v1548_v20 = vpack.c.bf16 %v1416_v19, %v1415_v17  ;;  %v1417_v21 = vsel %vm1411_vm13, %v1408_v14, %v1414_v18 }
 0x1b6   : > { %v1549_v22 = vpack.c.bf16 %v1417_v21, %v1417_v21 }
 0x1b7   : > { %1431 = vst [vmem:[%s250_s10] sm:$0xff] %v1548_v20 }
 0x1b8   : > { %1432 = vst [vmem:[%s250_s10 + $0x8] sm:$0xf] %v1549_v22 }
 0x1b9 PF: > { %s14_s15 = sadd.s32 1, %s1651_s15  }
 0x1ba   : > { %p11_p6 = scmp.ge.s32.totalorder %s14_s15, 4  }
 0x1bc   :  { %13 = sbr.rel (!%p11_p6) target bundleno = 1 (0x1), region = 77 }

// kernel: a_call__.3
= control target key start
LH: loop header
LB: loop body
LE: loop exit
PB: predicated region body
PF: predicated region fallthrough
CT: control target
= control target key end

     0   :  { %s1536_s15 = smov 0   ;;  %s1720_s0 = inlined_call_operand.vmem [shape: bf16[9,8,8], index: 0, kind: input, shape index: {}]   ;;  %s1721_s1 = inlined_call_operand.vmem [shape: f32[8,1], index: 1, kind: input, shape index: {}]   ;;  %s1722_s2 = inlined_call_operand.vmem [shape: bf16[8,896], index: 2, kind: input, shape index: {}, may-alias: {2,3}]   ;;  %s1723_s3 = inlined_call_operand.vmem [shape: bf16[8,896], index: 3, kind: input, shape index: {}, may-alias: {2,3}]   ;;  %s1724_s4 = inlined_call_operand.vmem [shape: f32[8,768], index: 4, kind: output, shape index: {}]  }
   0x1 LB: > { %s1343_s16 = sadd.s32 4294967295, %s1498_s15   ;;  %p1347_p0 = scmp.ge.s32.totalorder %s1498_s15, 1  ;;  %s1498_s15 = sphi %s1536_s15, %s14_s15  }
   0x2   : > { %p188_p1 = scmp.lt.s32.totalorder %s1498_s15, 3 }
   0x4   : > { %p189_p2 = pnand %p1347_p0, %p188_p1 }
   0x5   : > { %s1544_s17 = smul.u32 (!%p189_p2), 3, %s1343_s16  ;;  %s238_s18 = sadd.s32 (!%p189_p2), 1, %s1343_s16  ;;  %v1501_v5 = vmov (!%p189_p2), 0.0   ;;  %v1502_v6 = vmov (!%p189_p2), 0   ;;  %vm1503_vm0 = vmmov (!%p189_p2), 0   ;;  %v1254_v10 = vld [vmem:[%s1721_s1] sm:$0xff] (!%p189_p2) }
   0x6   : > { %192 = sbr.rel (%p189_p2) target bundleno = 437 (0x1b5), region = 36  ;;  %s1500_s26 = smov (!%p189_p2), 127   ;;  %1413 = vmatprep.subr.bf16.mxu1 (!%p189_p2), %v1501_v5  ;;  %334 = vmatprep.mubr.bf16.mxu0 (!%p189_p2), %v1502_v6  ;;  %vm284_vm1 = vcmask (!%p189_p2), 1039360   ;;  %vm292_vm2 = vcmask (!%p189_p2), 1043456   ;;  %v1351_v19 = vld [vmem:[%s1720_s0 + $0x4] sm:$0xf] (!%p189_p2) }
   0x7   : > { %p229_p3 = scmp.lt.s32.totalorder (!%p189_p2), %s1544_s17, 6  ;;  %s239_s19 = smul.u32 (!%p189_p2), 3, %s238_s18  ;;  %1486 = vset.pattern.permute.xlu0 (!%p189_p2), %v1502_v6  ;;  %1415 = vmatprep.mubr.msk.bf16.mxu1 (!%p189_p2), %vm1503_vm0, %v1501_v5  ;;  %vm288_vm3 = vcmask (!%p189_p2), 64512   ;;  %vm494_vm4 = vcmask (!%p189_p2), 1031168   ;;  %v259_v31 = vld [vmem:[%s1720_s0] sm:$0xf] (!%p189_p2) }
   0x8   : > { %s1504_s30 = smov (!%p189_p2), 126   ;;  %s1505_s5 = smov (!%p189_p2), 110   ;;  %vm604_vm5 = vcmask (!%p189_p2), 900096   ;;  %v1365_v41 = vld [vmem:[%s1720_s0 + $0x8] sm:$0xf] (!%p189_p2)  ;;  %vm714_vm6 = vcmask (!%p189_p2), 891904  }
   0x9   : > { %p240_p4 = scmp.lt.s32.totalorder (!%p189_p2), %s239_s19, 6  ;;  %s1506_s6 = smov (!%p189_p2), 109   ;;  %v1369_v51 = vld [vmem:[%s1720_s0 + $0xc] sm:$0xf] (!%p189_p2)  ;;  %vm824_vm7 = vcmask (!%p189_p2), 883712   ;;  %vm934_vm8 = vcmask (!%p189_p2), 752640  }
   0xa   : > { %s1507_s7 = smov (!%p189_p2), 108   ;;  %s1508_s8 = smov (!%p189_p2), 92   ;;  %v1373_v61 = vld [vmem:[%s1720_s0 + $0x10] sm:$0xf] (!%p189_p2)  ;;  %vm1044_vm9 = vcmask (!%p189_p2), 744448   ;;  %vm1154_vm10 = vcmask (!%p189_p2), 736256  }
   0xb   : > { %s1509_s9 = smov (!%p189_p2), 91   ;;  %s1510_s10 = smov (!%p189_p2), 90  }
   0xc   : > { %p247_p5 = scmp.lt.s32.totalorder (!%p189_p2), %s1544_s17, 5 }
   0xd   : > { %s230_s20 = scalar_select %p229_p3, %s1544_s17, 6 }
   0xe   : > { %s1726_s19 = smov (!%p240_p4, %s239_s19), 6  ;;  %s1728_s17 = smov (!%p247_p5, %s1544_s17), 5 }
   0xf   : > { %s1348_s21 = sshll.u32 %s230_s20, 2  ;;  %s1349_s25 = sshll.u32 %s1726_s19, 2 }
  0x10   : > { %s232_s24 = scalar_lea.vmem %s1722_s2, %s1348_s21  ;;  %s243_s29 = scalar_lea.vmem %s1723_s3, %s1349_s25 }
  0x11   : > { %v253_v0 = vld [vmem:[%s232_s24] sm:$0xff]  ;;  %v254_v1 = vld [vmem:[%s232_s24 + $0x8] sm:$0xf] }
  0x12   : > { %v1551_v2 = vcombine.low %v253_v0, %v253_v0  ;;  %256 = vst [vmem:[#allocation2 + $0x8] sm:$0xf] %v254_v1  ;;  %v1557_v3 = vcombine.high %v253_v0, %v253_v0  ;;  %v257_v4 = vld [vmem:[%s243_s29] sm:$0xf] }
  0x13   : > { %258 = vst [vmem:[#allocation2 + $0xc] sm:$0xf] %v257_v4 }
  0x14   : > { %276 = vrot.lane.b32.xlu0 %v1551_v2, %s1500_s26  ;;  %v395_v21 = vsel %vm292_vm2, %v1551_v2, 0 }
  0x18   : > { %278 = vrot.lane.b32.xlu0 %v1557_v3, %s1500_s26 }
  0x19   : > { %v1491_v22 = vld [vmem:[#allocation2 + $0x8] ss:$0 sps:$4 sm:$0xff]  }
  0x1a   : > { %v265_v7 = vld [vmem:[#allocation2 + $0x8] sm:$0xff]  ;;  %v401_v26 = vsel %vm292_vm2, %v1491_v22, 0 }
  0x1b   : > { %v1354_v8 = vcombine.low %v265_v7, %v265_v7  ;;  %v1355_v9 = vcombine.high %v265_v7, %v265_v7 }
  0x1c   : > { %486 = vrot.lane.b32.xlu0 %v1551_v2, %s1504_s30 }
  0x1d   : > { %280 = vrot.lane.b32.xlu1 %v1354_v8, %s1500_s26 }
  0x20   : > { %490 = vrot.lane.b32.xlu0 %v1354_v8, %s1504_s30 }
  0x21   : > { %282 = vrot.lane.b32.xlu1 %v1355_v9, %s1500_s26 }
  0x24   : > { %596 = vrot.lane.b32.xlu0 %v1551_v2, %s1505_s5 }
  0x25   : > { %488 = vrot.lane.b32.xlu1 %v1557_v3, %s1504_s30 }
  0x28   : > { %600 = vrot.lane.b32.xlu0 %v1354_v8, %s1505_s5 }
  0x29   : > { %492 = vrot.lane.b32.xlu1 %v1355_v9, %s1504_s30 }
  0x2c   : > { %706 = vrot.lane.b32.xlu0 %v1551_v2, %s1506_s6 }
  0x2d   : > { %598 = vrot.lane.b32.xlu1 %v1557_v3, %s1505_s5 }
  0x30   : > { %710 = vrot.lane.b32.xlu0 %v1354_v8, %s1506_s6 }
  0x31   : > { %602 = vrot.lane.b32.xlu1 %v1355_v9, %s1505_s5 }
  0x34   : > { %816 = vrot.lane.b32.xlu0 %v1551_v2, %s1507_s7 }
  0x35   : > { %708 = vrot.lane.b32.xlu1 %v1557_v3, %s1506_s6 }
  0x38   : > { %820 = vrot.lane.b32.xlu0 %v1354_v8, %s1507_s7 }
  0x39   : > { %712 = vrot.lane.b32.xlu1 %v1355_v9, %s1506_s6 }
  0x3c   : > { %926 = vrot.lane.b32.xlu0 %v1551_v2, %s1508_s8 }
  0x3d   : > { %818 = vrot.lane.b32.xlu1 %v1557_v3, %s1507_s7 }
  0x40   : > { %930 = vrot.lane.b32.xlu0 %v1354_v8, %s1508_s8 }
  0x41   : > { %822 = vrot.lane.b32.xlu1 %v1355_v9, %s1507_s7  ;;  %s1350_s7 = sshll.u32 %s1728_s17, 3 }
  0x44   : > { %1036 = vrot.lane.b32.xlu0 %v1551_v2, %s1509_s9 }
  0x45   : > { %928 = vrot.lane.b32.xlu1 %v1557_v3, %s1508_s8 }
  0x48   : > { %1040 = vrot.lane.b32.xlu0 %v1354_v8, %s1509_s9 }
  0x49   : > { %932 = vrot.lane.b32.xlu1 %v1355_v9, %s1508_s8 }
  0x4c   : > { %1146 = vrot.lane.b32.xlu0 %v1551_v2, %s1510_s10 }
  0x4d   : > { %1038 = vrot.lane.b32.xlu1 %v1557_v3, %s1509_s9 }
  0x50   : > { %1150 = vrot.lane.b32.xlu0 %v1354_v8, %s1510_s10 }
  0x51   : > { %1042 = vrot.lane.b32.xlu1 %v1355_v9, %s1509_s9 }
  0x54   : > { %1257 = vperm.xlu0 %1486, %v1254_v10  }
  0x55   : > { %1148 = vrot.lane.b32.xlu1 %v1557_v3, %s1510_s10 }
  0x59   : > { %1152 = vrot.lane.b32.xlu1 %v1355_v9, %s1510_s10  ;;  %v1377_v9 = vld [vmem:[%s1720_s0 + $0x14] sm:$0xf]  ;;  %s250_s10 = scalar_lea.vmem %s1724_s4, %s1350_s7 }
  0x86   : > { %v277_v11 = vpop.permute.xlu0 %276 }
  0x8a   : > { %v279_v12 = vpop.permute.xlu0 %278 }
  0x8b   : > { %v285_v14 = vsel %vm284_vm1, %v277_v11, %v279_v12 }
  0x8c   : > { %v294_v16 = vsel %vm292_vm2, %v285_v14, 0 }
  0x8e   : > { %v487_v13 = vpop.permute.xlu0 %486 }
  0x8f   : > { %v281_v15 = vpop.permute.xlu1 %280 }
  0x90   : > { %v286_v18 = vsel %vm284_vm1, %v279_v12, %v281_v15 }
  0x91   : > { %1356 = vmatprep.subr.msk.bf16.mxu0 %vm292_vm2, %v286_v18  ;;  %v1381_v18 = vld [vmem:[%s1720_s0 + $0x18] sm:$0xf] }
  0x92   : > { %v491_v17 = vpop.permute.xlu0 %490  ;;  %303 = vmatpush1.bf16.msra.mxu0 %v294_v16 }
  0x93   : > { %v283_v20 = vpop.permute.xlu1 %282  ;;  %1362 = vmatprep.subr.msk.bf16.mxu0 %vm292_vm2, %v1557_v3 }
  0x94   : > { %v287_v24 = vsel %vm284_vm1, %v281_v15, %v283_v20 }
  0x95   : > { %v300_v25 = vsel %vm292_vm2, %v287_v24, 0  ;;  %1357 = vmatmul.mubr.msk.bf16.vlgmr.msra.gmra.mrb[0].mxu0 %vm288_vm3, %v1351_v19 }
  0x96   : > { %v597_v23 = vpop.permute.xlu0 %596  ;;  %1414 = vmatpush3.bf16.msra.mxu1 %v300_v25  ;;  %404 = vmatpush1.bf16.msra.mxu0 %v395_v21 }
  0x97   : > { %1419 = vmatprep.subr.bf16.mxu1 %v1501_v5  ;;  %v489_v27 = vpop.permute.xlu1 %488  ;;  %435 = vmatprep.mubr.bf16.mxu0 %v1502_v6 }
  0x98   : > { %v495_v29 = vsel %vm494_vm4, %v487_v13, %v489_v27  ;;  %v496_v30 = vsel %vm494_vm4, %v489_v27, %v491_v17  ;;  %v1385_v27 = vld [vmem:[%s1720_s0 + $0x1c] sm:$0xf] }
  0x99   : > { %1416 = vmatmul.mubr.msk.bf16.vlgmr.msra.gmra.mrb[0].mxu1 %vm288_vm3, %v1351_v19  ;;  %1366 = vmatprep.subr.msk.bf16.mxu0 %vm292_vm2, %v496_v30  ;;  %v502_v32 = vsel %vm292_vm2, %v495_v29, 0 }
  0x9a   : > { %v601_v28 = vpop.permute.xlu0 %600  ;;  %1420 = vmatpush3.bf16.msra.mxu1 %v401_v26  ;;  %1421 = vmatprep.mubr.msk.bf16.mxu1 %vm1503_vm0, %v1501_v5 }
  0x9b   : > { %v493_v33 = vpop.permute.xlu1 %492  ;;  %1425 = vmatprep.subr.bf16.mxu1 %v1501_v5 }
  0x9c   : > { %v497_v35 = vsel %vm494_vm4, %v491_v17, %v493_v33 }
  0x9d   : > { %1363 = vmatmul.mubr.msk.bf16.vlgmr.msra.gmra.mrb[4].mxu0 %vm288_vm3, %v259_v31  ;;  %v508_v36 = vsel %vm292_vm2, %v497_v35, 0 }
  0x9e   : > { %v707_v34 = vpop.permute.xlu0 %706  ;;  %511 = vmatpush1.bf16.msra.mxu0 %v502_v32  ;;  %542 = vmatprep.mubr.bf16.mxu0 %v1502_v6  ;;  %v1389_v32 = vld [vmem:[%s1720_s0 + $0x20] sm:$0xf] }
  0x9f   : > { %v599_v37 = vpop.permute.xlu1 %598 }
  0xa0   : > { %v605_v39 = vsel %vm604_vm5, %v597_v23, %v599_v37  ;;  %v606_v40 = vsel %vm604_vm5, %v599_v37, %v601_v28 }
  0xa1   : > { %1422 = vmatmul.mubr.msk.bf16.vlgmr.msra.gmra.mrb[4].mxu1 %vm288_vm3, %v259_v31  ;;  %1370 = vmatprep.subr.msk.bf16.mxu0 %vm292_vm2, %v606_v40  ;;  %v612_v42 = vsel %vm292_vm2, %v605_v39, 0 }
  0xa2   : > { %v711_v38 = vpop.permute.xlu0 %710  ;;  %1426 = vmatpush3.bf16.msra.mxu1 %v508_v36  ;;  %1427 = vmatprep.mubr.msk.bf16.mxu1 %vm1503_vm0, %v1501_v5 }
  0xa3   : > { %v603_v43 = vpop.permute.xlu1 %602  ;;  %1431 = vmatprep.subr.bf16.mxu1 %v1501_v5 }
  0xa4   : > { %v607_v45 = vsel %vm604_vm5, %v601_v28, %v603_v43 }
  0xa5   : > { %1367 = vmatmul.mubr.msk.bf16.vlgmr.msra.gmra.mrb[8].mxu0 %vm288_vm3, %v1365_v41  ;;  %v618_v46 = vsel %vm292_vm2, %v607_v45, 0 }
  0xa6   : > { %v817_v44 = vpop.permute.xlu0 %816  ;;  %621 = vmatpush1.bf16.msra.mxu0 %v612_v42  ;;  %652 = vmatprep.mubr.bf16.mxu0 %v1502_v6 }
  0xa7   : > { %v709_v47 = vpop.permute.xlu1 %708 }
  0xa8   : > { %v715_v49 = vsel %vm714_vm6, %v707_v34, %v709_v47  ;;  %v716_v50 = vsel %vm714_vm6, %v709_v47, %v711_v38 }
  0xa9   : > { %1428 = vmatmul.mubr.msk.bf16.vlgmr.msra.gmra.mrb[8].mxu1 %vm288_vm3, %v1365_v41  ;;  %1374 = vmatprep.subr.msk.bf16.mxu0 %vm292_vm2, %v716_v50  ;;  %v722_v52 = vsel %vm292_vm2, %v715_v49, 0 }
  0xaa   : > { %v821_v48 = vpop.permute.xlu0 %820  ;;  %1432 = vmatpush3.bf16.msra.mxu1 %v618_v46  ;;  %1433 = vmatprep.mubr.msk.bf16.mxu1 %vm1503_vm0, %v1501_v5 }
  0xab   : > { %v713_v53 = vpop.permute.xlu1 %712  ;;  %1437 = vmatprep.subr.bf16.mxu1 %v1501_v5 }
  0xac   : > { %v717_v55 = vsel %vm714_vm6, %v711_v38, %v713_v53 }
  0xad   : > { %1371 = vmatmul.mubr.msk.bf16.vlgmr.msra.gmra.mrb[12].mxu0 %vm288_vm3, %v1369_v51  ;;  %v728_v56 = vsel %vm292_vm2, %v717_v55, 0 }
  0xae   : > { %v927_v54 = vpop.permute.xlu0 %926  ;;  %731 = vmatpush1.bf16.msra.mxu0 %v722_v52  ;;  %762 = vmatprep.mubr.bf16.mxu0 %v1502_v6 }
  0xaf   : > { %v819_v57 = vpop.permute.xlu1 %818 }
  0xb0   : > { %v825_v59 = vsel %vm824_vm7, %v817_v44, %v819_v57  ;;  %v826_v60 = vsel %vm824_vm7, %v819_v57, %v821_v48 }
  0xb1   : > { %1434 = vmatmul.mubr.msk.bf16.vlgmr.msra.gmra.mrb[12].mxu1 %vm288_vm3, %v1369_v51  ;;  %1378 = vmatprep.subr.msk.bf16.mxu0 %vm292_vm2, %v826_v60  ;;  %v832_v62 = vsel %vm292_vm2, %v825_v59, 0 }
  0xb2   : > { %v931_v58 = vpop.permute.xlu0 %930  ;;  %1438 = vmatpush3.bf16.msra.mxu1 %v728_v56  ;;  %1439 = vmatprep.mubr.msk.bf16.mxu1 %vm1503_vm0, %v1501_v5 }
  0xb3   : > { %v823_v63 = vpop.permute.xlu1 %822  ;;  %1443 = vmatprep.subr.bf16.mxu1 %v1501_v5 }
  0xb4   : > { %v827_v1 = vsel %vm824_vm7, %v821_v48, %v823_v63 }
  0xb5   : > { %1375 = vmatmul.mubr.msk.bf16.vlgmr.msra.gmra.mrb[16].mxu0 %vm288_vm3, %v1373_v61  ;;  %v838_v2 = vsel %vm292_vm2, %v827_v1, 0 }
  0xb6   : > { %v1037_v0 = vpop.permute.xlu0 %1036  ;;  %841 = vmatpush1.bf16.msra.mxu0 %v832_v62  ;;  %872 = vmatprep.mubr.bf16.mxu0 %v1502_v6 }
  0xb7   : > { %v929_v3 = vpop.permute.xlu1 %928 }
  0xb8   : > { %v935_v4 = vsel %vm934_vm8, %v927_v54, %v929_v3  ;;  %v936_v7 = vsel %vm934_vm8, %v929_v3, %v931_v58 }
  0xb9   : > { %1440 = vmatmul.mubr.msk.bf16.vlgmr.msra.gmra.mrb[16].mxu1 %vm288_vm3, %v1373_v61  ;;  %1382 = vmatprep.subr.msk.bf16.mxu0 %vm292_vm2, %v936_v7  ;;  %v942_v10 = vsel %vm292_vm2, %v935_v4, 0 }
  0xba   : > { %v1041_v8 = vpop.permute.xlu0 %1040  ;;  %1444 = vmatpush3.bf16.msra.mxu1 %v838_v2  ;;  %1445 = vmatprep.mubr.msk.bf16.mxu1 %vm1503_vm0, %v1501_v5 }
  0xbb   : > { %v933_v11 = vpop.permute.xlu1 %932  ;;  %1449 = vmatprep.subr.bf16.mxu1 %v1501_v5 }
  0xbc   : > { %v937_v12 = vsel %vm934_vm8, %v931_v58, %v933_v11 }
  0xbd   : > { %1379 = vmatmul.mubr.msk.bf16.vlgmr.msra.gmra.mrb[20].mxu0 %vm288_vm3, %v1377_v9  ;;  %v948_v13 = vsel %vm292_vm2, %v937_v12, 0 }
  0xbe   : > { %951 = vmatpush1.bf16.msra.mxu0 %v942_v10  ;;  %982 = vmatprep.mubr.bf16.mxu0 %v1502_v6  ;;  %v1147_v15 = vpop.permute.xlu0 %1146 }
  0xbf   : > { %v1039_v14 = vpop.permute.xlu1 %1038 }
  0xc0   : > { %v1045_v16 = vsel %vm1044_vm9, %v1037_v0, %v1039_v14  ;;  %v1046_v17 = vsel %vm1044_vm9, %v1039_v14, %v1041_v8 }
  0xc1   : > { %1446 = vmatmul.mubr.msk.bf16.vlgmr.msra.gmra.mrb[20].mxu1 %vm288_vm3, %v1377_v9  ;;  %1386 = vmatprep.subr.msk.bf16.mxu0 %vm292_vm2, %v1046_v17  ;;  %v1052_v19 = vsel %vm292_vm2, %v1045_v16, 0 }
  0xc2   : > { %1450 = vmatpush3.bf16.msra.mxu1 %v948_v13  ;;  %1451 = vmatprep.mubr.msk.bf16.mxu1 %vm1503_vm0, %v1501_v5  ;;  %v1151_v22 = vpop.permute.xlu0 %1150 }
  0xc3   : > { %v1043_v20 = vpop.permute.xlu1 %1042  ;;  %1455 = vmatprep.subr.bf16.mxu1 %v1501_v5 }
  0xc4   : > { %v1047_v21 = vsel %vm1044_vm9, %v1041_v8, %v1043_v20 }
  0xc5   : > { %1383 = vmatmul.mubr.msk.bf16.vlgmr.msra.gmra.mrb[24].mxu0 %vm288_vm3, %v1381_v18  ;;  %v1058_v23 = vsel %vm292_vm2, %v1047_v21, 0 }
  0xc6   : > { %1061 = vmatpush1.bf16.msra.mxu0 %v1052_v19  ;;  %1092 = vmatprep.mubr.bf16.mxu0 %v1502_v6 }
  0xc7   : > { %v1149_v24 = vpop.permute.xlu1 %1148 }
  0xc8   : > { %v1155_v25 = vsel %vm1154_vm10, %v1147_v15, %v1149_v24  ;;  %v1156_v26 = vsel %vm1154_vm10, %v1149_v24, %v1151_v22 }
  0xc9   : > { %1452 = vmatmul.mubr.msk.bf16.vlgmr.msra.gmra.mrb[24].mxu1 %vm288_vm3, %v1381_v18  ;;  %1390 = vmatprep.subr.msk.bf16.mxu0 %vm292_vm2, %v1156_v26  ;;  %v1162_v28 = vsel %vm292_vm2, %v1155_v25, 0 }
  0xca   : > { %1456 = vmatpush3.bf16.msra.mxu1 %v1058_v23  ;;  %1457 = vmatprep.mubr.msk.bf16.mxu1 %vm1503_vm0, %v1501_v5 }
  0xcb   : > { %v1153_v29 = vpop.permute.xlu1 %1152  ;;  %1461 = vmatprep.subr.bf16.mxu1 %v1501_v5 }
  0xcc   : > { %v1157_v30 = vsel %vm1154_vm10, %v1151_v22, %v1153_v29 }
  0xcd   : > { %1387 = vmatmul.mubr.msk.bf16.vlgmr.msra.gmra.mrb[28].mxu0 %vm288_vm3, %v1385_v27  ;;  %v1168_v31 = vsel %vm292_vm2, %v1157_v30, 0 }
  0xce   : > { %1171 = vmatpush1.bf16.msra.mxu0 %v1162_v28  ;;  %1202 = vmatprep.mubr.bf16.mxu0 %v1502_v6 }
  0xd1   : > { %1458 = vmatmul.mubr.msk.bf16.vlgmr.msra.gmra.mrb[28].mxu1 %vm288_vm3, %v1385_v27 }
  0xd2   : > { %1462 = vmatpush3.bf16.msra.mxu1 %v1168_v31  ;;  %1463 = vmatprep.mubr.msk.bf16.mxu1 %vm1503_vm0, %v1501_v5 }
  0xd5   : > { %1391 = vmatmul.mubr.msk.bf16.vlgmr.msra.gmra.mrb[32].mxu0 %vm288_vm3, %v1389_v32 }
  0xd9   : > { %1464 = vmatmul.mubr.msk.bf16.vlgmr.msra.gmra.mrb[32].mxu1 %vm288_vm3, %v1389_v32 }
 0x168   : > { %v336_v33 = vpop.f32.mrb[0].mxu0 }
 0x169   : > { %v338_v34 = vpop.f32.mrb[1].mxu0 }
 0x16a   : > { %v340_v35 = vpop.f32.mrb[2].mxu0 }
 0x16b   : > { %v341_v6 = vpop.f32.mrb[3].mxu0 }
 0x16c   : > { %v377_v36 = vpop.f32.mrb[0].mxu1 }
 0x16d   : > { %v1417_v37 = vpop.f32.mrb[1].mxu1 }
 0x16e   : > { %v380_v38 = vpop.f32.mrb[2].mxu1 }
 0x16f   : > { %v1418_v39 = vpop.f32.mrb[3].mxu1 }
 0x170   : > { %v437_v40 = vpop.f32.mrb[4].mxu0 }
 0x171   : > { %v438_v41 = vadd.f32 %v437_v40, %v336_v33  ;;  %v439_v42 = vpop.f32.mrb[5].mxu0 }
 0x172   : > { %v440_v43 = vadd.f32 %v439_v42, %v338_v34  ;;  %v441_v44 = vpop.f32.mrb[6].mxu0 }
 0x173   : > { %v442_v45 = vpop.f32.mrb[7].mxu0 }
 0x174   : > { %v478_v46 = vpop.f32.mrb[4].mxu1 }
 0x175   : > { %v479_v5 = vadd.f32 %v478_v46, %v377_v36  ;;  %v1423_v47 = vpop.f32.mrb[5].mxu1 }
 0x176   : > { %v481_v48 = vpop.f32.mrb[6].mxu1 }
 0x177   : > { %v1424_v49 = vpop.f32.mrb[7].mxu1 }
 0x178   : > { %v544_v50 = vpop.f32.mrb[8].mxu0 }
 0x179   : > { %v591_v51 = vadd.f32 %v544_v50, %v438_v41  ;;  %v546_v52 = vpop.f32.mrb[9].mxu0 }
 0x17a   : > { %v592_v53 = vadd.f32 %v546_v52, %v440_v43  ;;  %v548_v54 = vpop.f32.mrb[10].mxu0 }
 0x17b   : > { %v549_v55 = vpop.f32.mrb[11].mxu0 }
 0x17c   : > { %v585_v56 = vpop.f32.mrb[8].mxu1 }
 0x17d   : > { %v593_v57 = vadd.f32 %v585_v56, %v479_v5  ;;  %v1429_v58 = vpop.f32.mrb[9].mxu1 }
 0x17e   : > { %v588_v59 = vpop.f32.mrb[10].mxu1 }
 0x17f   : > { %v1430_v60 = vpop.f32.mrb[11].mxu1 }
 0x180   : > { %v654_v61 = vpop.f32.mrb[12].mxu0 }
 0x181   : > { %v701_v62 = vadd.f32 %v654_v61, %v591_v51  ;;  %v656_v63 = vpop.f32.mrb[13].mxu0 }
 0x182   : > { %v702_v0 = vadd.f32 %v656_v63, %v592_v53  ;;  %v658_v1 = vpop.f32.mrb[14].mxu0  ;;  %v1258_v53 = vpop.permute.xlu0 %1257 }
 0x183   : > { %v659_v2 = vpop.f32.mrb[15].mxu0 }
 0x184   : > { %v695_v3 = vpop.f32.mrb[12].mxu1 }
 0x185   : > { %v703_v4 = vadd.f32 %v695_v3, %v593_v57  ;;  %v1435_v7 = vpop.f32.mrb[13].mxu1 }
 0x186   : > { %v698_v8 = vpop.f32.mrb[14].mxu1 }
 0x187   : > { %v1436_v9 = vpop.f32.mrb[15].mxu1 }
 0x188   : > { %v764_v10 = vpop.f32.mrb[16].mxu0 }
 0x189   : > { %v811_v11 = vadd.f32 %v764_v10, %v701_v62  ;;  %v766_v12 = vpop.f32.mrb[17].mxu0 }
 0x18a   : > { %v812_v13 = vadd.f32 %v766_v12, %v702_v0  ;;  %v768_v14 = vpop.f32.mrb[18].mxu0 }
 0x18b   : > { %v769_v15 = vpop.f32.mrb[19].mxu0 }
 0x18c   : > { %v805_v16 = vpop.f32.mrb[16].mxu1 }
 0x18d   : > { %v813_v17 = vadd.f32 %v805_v16, %v703_v4  ;;  %v1441_v18 = vpop.f32.mrb[17].mxu1 }
 0x18e   : > { %v808_v19 = vpop.f32.mrb[18].mxu1 }
 0x18f   : > { %v1442_v20 = vpop.f32.mrb[19].mxu1 }
 0x190   : > { %v874_v21 = vpop.f32.mrb[20].mxu0 }
 0x191   : > { %v921_v22 = vadd.f32 %v874_v21, %v811_v11  ;;  %v876_v23 = vpop.f32.mrb[21].mxu0 }
 0x192   : > { %v922_v24 = vadd.f32 %v876_v23, %v812_v13  ;;  %v878_v25 = vpop.f32.mrb[22].mxu0 }
 0x193   : > { %v879_v26 = vpop.f32.mrb[23].mxu0 }
 0x194   : > { %v915_v27 = vpop.f32.mrb[20].mxu1 }
 0x195   : > { %v923_v28 = vadd.f32 %v915_v27, %v813_v17  ;;  %v1447_v29 = vpop.f32.mrb[21].mxu1 }
 0x196   : > { %v918_v30 = vpop.f32.mrb[22].mxu1 }
 0x197   : > { %v1448_v31 = vpop.f32.mrb[23].mxu1 }
 0x198   : > { %v984_v32 = vpop.f32.mrb[24].mxu0 }
 0x199   : > { %v1031_v33 = vadd.f32 %v984_v32, %v921_v22  ;;  %v986_v34 = vpop.f32.mrb[25].mxu0 }
 0x19a   : > { %v1032_v35 = vadd.f32 %v986_v34, %v922_v24  ;;  %v988_v6 = vpop.f32.mrb[26].mxu0 }
 0x19b   : > { %v989_v36 = vpop.f32.mrb[27].mxu0 }
 0x19c   : > { %v1025_v37 = vpop.f32.mrb[24].mxu1 }
 0x19d   : > { %v1033_v38 = vadd.f32 %v1025_v37, %v923_v28  ;;  %v1453_v39 = vpop.f32.mrb[25].mxu1 }
 0x19e   : > { %v1028_v40 = vpop.f32.mrb[26].mxu1 }
 0x19f   : > { %v1454_v41 = vpop.f32.mrb[27].mxu1 }
 0x1a0   : > { %v1094_v42 = vpop.f32.mrb[28].mxu0 }
 0x1a1   : > { %v1141_v43 = vadd.f32 %v1094_v42, %v1031_v33  ;;  %v1096_v44 = vpop.f32.mrb[29].mxu0 }
 0x1a2   : > { %v1142_v45 = vadd.f32 %v1096_v44, %v1032_v35  ;;  %v1098_v46 = vpop.f32.mrb[30].mxu0 }
 0x1a3   : > { %v1099_v5 = vpop.f32.mrb[31].mxu0 }
 0x1a4   : > { %v1135_v47 = vpop.f32.mrb[28].mxu1 }
 0x1a5   : > { %v1143_v48 = vadd.f32 %v1135_v47, %v1033_v38  ;;  %v1459_v49 = vpop.f32.mrb[29].mxu1 }
 0x1a6   : > { %v1138_v50 = vpop.f32.mrb[30].mxu1 }
 0x1a7   : > { %v1460_v51 = vpop.f32.mrb[31].mxu1 }
 0x1a8   : > { %v1204_v52 = vpop.f32.mrb[32].mxu0 }
 0x1a9   : > { %v1251_v54 = vadd.f32 %v1204_v52, %v1141_v43  ;;  %v1206_v55 = vpop.f32.mrb[33].mxu0 }
 0x1aa   : > { %v1252_v56 = vadd.f32 %v1206_v55, %v1142_v45  ;;  %v1208_v57 = vpop.f32.mrb[34].mxu0 }
 0x1ab   : > { %v1260_v58 = vadd.f32 %v1258_v53, %v1251_v54  ;;  %v1209_v59 = vpop.f32.mrb[35].mxu0 }
 0x1ac   : > { %v1245_v60 = vpop.f32.mrb[32].mxu1  ;;  %v1261_v61 = vadd.f32 %v1258_v53, %v1252_v56 }
 0x1ad   : > { %v1253_v62 = vadd.f32 %v1245_v60, %v1143_v48  ;;  %v1465_v63 = vpop.f32.mrb[33].mxu1  ;;  %vm1263_vm11 = vcmp.ge.f32.partialorder %v1260_v58, 0.0  ;;  %v1266_v0 = vmul.f32 0.2, %v1260_v58 }
 0x1ae   : > { %vm1264_vm12 = vcmp.ge.f32.partialorder %v1261_v61, 0.0  ;;  %v1267_v1 = vmul.f32 0.2, %v1261_v61  ;;  %v1248_v2 = vpop.f32.mrb[34].mxu1 }
 0x1af   : > { %v1262_v3 = vadd.f32 %v1258_v53, %v1253_v62  ;;  %v1269_v4 = vsel %vm1263_vm11, %v1260_v58, %v1266_v0  ;;  %v1466_v7 = vpop.f32.mrb[35].mxu1 }
 0x1b0   : > { %v1270_v8 = vsel %vm1264_vm12, %v1261_v61, %v1267_v1  ;;  %1272 = vst [vmem:[%s250_s10] sm:$0xff] %v1269_v4 }
 0x1b1   : > { %vm1265_vm13 = vcmp.ge.f32.partialorder %v1262_v3, 0.0  ;;  %v1268_v9 = vmul.f32 0.2, %v1262_v3  ;;  %1273 = vst [vmem:[%s250_s10 + $0x8] sm:$0xff] %v1270_v8 }
 0x1b3   : > { %v1271_v10 = vsel %vm1265_vm13, %v1262_v3, %v1268_v9 }
 0x1b4   : > { %1274 = vst [vmem:[%s250_s10 + $0x10] sm:$0xff] %v1271_v10 }
 0x1b5 PF: > { %s14_s15 = sadd.s32 1, %s1498_s15  }
 0x1b6   : > { %p11_p6 = scmp.ge.s32.totalorder %s14_s15, 4  }
 0x1b8   :  { %13 = sbr.rel (!%p11_p6) target bundleno = 1 (0x1), region = 77 }

</bundles_post_ra>
